<compile_context>
chip_gen: v7x
topology: tpu7x:2x2x1
jax: 0.10.0
libtpu: 0.0.40
codegen_flags: <defaults>
</compile_context>

<pallas_src>
import jax
import jax.numpy as jnp
from jax.experimental import pallas as pl
from jax.experimental.pallas import tpu as pltpu

LANE = 128        # lane width: padded output feature dim for unmasked stores
TILE_B = 512      # batch rows per grid step (multiple of 8 sublanes)


def mlp_kernel(x_ref,
               w1_ref, b1_ref,
               w2_ref, b2_ref,
               w3_ref, b3_ref,
               w4_ref, b4_ref,
               o_ref):
    """Fused 4-layer MLP forward for one (TILE_B, in) batch tile.

    w4_ref/b4_ref are zero-padded to LANE output columns so o_ref is
    (TILE_B, LANE) and the store is lane-dense (unmasked vst).
    """
    x = x_ref[...]

    h = jnp.dot(x, w1_ref[...], preferred_element_type=jnp.float32) + b1_ref[...]
    h = jnp.maximum(h, 0.0)

    h = jnp.dot(h, w2_ref[...], preferred_element_type=jnp.float32) + b2_ref[...]
    h = jnp.maximum(h, 0.0)

    h = jnp.dot(h, w3_ref[...], preferred_element_type=jnp.float32) + b3_ref[...]
    h = jnp.maximum(h, 0.0)

    logits = jnp.dot(h, w4_ref[...], preferred_element_type=jnp.float32) + b4_ref[...]
    o_ref[...] = jax.nn.sigmoid(logits)


def net_forward(x, params, tile_b=TILE_B):
    """x: (B, input_size) float32. params: dict of (w_i, b_i), w_i (in, out), b_i (1, out)."""
    B, in_features = x.shape
    h1 = params["w1"].shape[1]
    h2 = params["w2"].shape[1]
    h3 = params["w3"].shape[1]
    out_features = params["w4"].shape[1]

    # --- lane-dense output: pad fc4 weight/bias out to LANE columns (zeros) ---
    w4p = jnp.zeros((params["w4"].shape[0], LANE), jnp.float32)
    w4p = w4p.at[:, :out_features].set(params["w4"])
    b4p = jnp.zeros((1, LANE), jnp.float32)
    b4p = b4p.at[:, :out_features].set(params["b4"])

    # --- pad batch to a multiple of tile_b (ragged last tile handled by padding) ---
    grid_b = pl.cdiv(B, tile_b)
    b_pad = grid_b * tile_b
    if b_pad != B:
        x = jnp.pad(x, ((0, b_pad - B), (0, 0)))

    def batch_map(i):
        return (i, 0)

    def pinned_map(i):
        return (0, 0)

    def full_spec(arr):
        return pl.BlockSpec(arr.shape, pinned_map)

    grid_spec = pltpu.PrefetchScalarGridSpec(
        num_scalar_prefetch=0,
        grid=(grid_b,),
        in_specs=[
            pl.BlockSpec((tile_b, in_features), batch_map),   # x: streamed per tile
            full_spec(params["w1"]), full_spec(params["b1"]),  # weights: resident
            full_spec(params["w2"]), full_spec(params["b2"]),
            full_spec(params["w3"]), full_spec(params["b3"]),
            full_spec(w4p), full_spec(b4p),
        ],
        out_specs=pl.BlockSpec((tile_b, LANE), batch_map),
    )

    flops = 2 * b_pad * (in_features * h1 + h1 * h2 + h2 * h3 + h3 * LANE)
    weight_bytes = sum(int(v.size) * 4 for v in
                       (params["w1"], params["b1"], params["w2"], params["b2"],
                        params["w3"], params["b3"], w4p, b4p))
    cost = pl.CostEstimate(
        flops=flops,
        transcendentals=b_pad * LANE,                       # sigmoid exp
        bytes_accessed=b_pad * (in_features + LANE) * 4 + weight_bytes,
    )

    out_padded = pl.pallas_call(
        mlp_kernel,
        out_shape=jax.ShapeDtypeStruct((b_pad, LANE), jnp.float32),
        grid_spec=grid_spec,
        compiler_params=pltpu.CompilerParams(
            dimension_semantics=("parallel",),              # shard batch tiles across TCs (v7x)
            vmem_limit_bytes=32 * 1024 * 1024,              # explicit, safe on v5e/v6e/v7x
        ),
        cost_estimate=cost,
    )(x,
      params["w1"], params["b1"],
      params["w2"], params["b2"],
      params["w3"], params["b3"],
      w4p, b4p)

    # drop padded rows and padded output lanes
    return out_padded[:B, :out_features]


def init_params(key, input_size=4, hidden=32, output_size=2):
    """Deterministic init mimicking torch Linear's uniform(-1/sqrt(fan_in), 1/sqrt(fan_in))."""
    dims = [(input_size, hidden),
            (hidden, hidden),
            (hidden, hidden // 2),
            (hidden // 2, output_size)]
    params = {}
    for i, (fan_in, fan_out) in enumerate(dims, start=1):
        key, kw, kb = jax.random.split(key, 3)
        bound = 1.0 / jnp.sqrt(jnp.float32(fan_in))
        # stored as (in, out): equivalent to torch weight (out, in) transposed
        params[f"w{i}"] = jax.random.uniform(
            kw, (fan_in, fan_out), jnp.float32, minval=-bound, maxval=bound)
        params[f"b{i}"] = jax.random.uniform(
            kb, (1, fan_out), jnp.float32, minval=-bound, maxval=bound)
    return params


def reference_forward(x, params):
    h = jnp.maximum(x @ params["w1"] + params["b1"], 0.0)
    h = jnp.maximum(h @ params["w2"] + params["b2"], 0.0)
    h = jnp.maximum(h @ params["w3"] + params["b3"], 0.0)
    return jax.nn.sigmoid(h @ params["w4"] + params["b4"])


if __name__ == "__main__":
    key = jax.random.PRNGKey(0)
    key, kx = jax.random.split(key)

    batch = 8
    input_size, output_size = 4, 2

    x = jax.random.normal(kx, (batch, input_size), dtype=jnp.float32)
    params = init_params(key, input_size=input_size, hidden=32, output_size=output_size)

    out = net_forward(x, params)
    out = jax.block_until_ready(out)

    ref = reference_forward(x, params)
    assert out.shape == (batch, output_size)
    assert jnp.allclose(out, ref, atol=1e-5, rtol=1e-5), "mismatch vs pure-JAX reference"

    # also exercise a ragged, multi-tile batch to verify the grid + padding path
    big_b = 2 * TILE_B + 37
    xb = jax.random.normal(jax.random.PRNGKey(1), (big_b, input_size), dtype=jnp.float32)
    out_big = jax.block_until_ready(net_forward(xb, params))
    ref_big = reference_forward(xb, params)
    assert out_big.shape == (big_b, output_size)
    assert jnp.allclose(out_big, ref_big, atol=1e-5, rtol=1e-5), "mismatch on ragged batch"

    print("KERNEL_OK")
</pallas_src>

<mosaic_0001>
module attributes {stable_mosaic.version = 11 : i64} {
  func.func @mlp_kernel(%arg0: i32, %arg1: memref<512x4xf32, #tpu.memory_space<vmem>>, %arg2: memref<4x32xf32, #tpu.memory_space<vmem>>, %arg3: memref<1x32xf32, #tpu.memory_space<vmem>>, %arg4: memref<32x32xf32, #tpu.memory_space<vmem>>, %arg5: memref<1x32xf32, #tpu.memory_space<vmem>>, %arg6: memref<32x16xf32, #tpu.memory_space<vmem>>, %arg7: memref<1x16xf32, #tpu.memory_space<vmem>>, %arg8: memref<16x128xf32, #tpu.memory_space<vmem>>, %arg9: memref<1x128xf32, #tpu.memory_space<vmem>>, %arg10: memref<512x128xf32, #tpu.memory_space<vmem>>) attributes {dimension_semantics = [#tpu.dimension_semantics<parallel>], iteration_bounds = array<i64: 1>, scalar_prefetch = 0 : i64, scratch_operands = 0 : i64, tpu.core_type = #tpu.core_type<tc>, window_params = [{transform_indices = @transform_0, window_bounds = array<i64: 512, 4>}, {pipeline_mode = #tpu.pipeline_mode<synchronous>, transform_indices = @transform_1, window_bounds = array<i64: 4, 32>}, {pipeline_mode = #tpu.pipeline_mode<synchronous>, transform_indices = @transform_2, window_bounds = array<i64: 1, 32>}, {pipeline_mode = #tpu.pipeline_mode<synchronous>, transform_indices = @transform_3, window_bounds = array<i64: 32, 32>}, {pipeline_mode = #tpu.pipeline_mode<synchronous>, transform_indices = @transform_4, window_bounds = array<i64: 1, 32>}, {pipeline_mode = #tpu.pipeline_mode<synchronous>, transform_indices = @transform_5, window_bounds = array<i64: 32, 16>}, {pipeline_mode = #tpu.pipeline_mode<synchronous>, transform_indices = @transform_6, window_bounds = array<i64: 1, 16>}, {pipeline_mode = #tpu.pipeline_mode<synchronous>, transform_indices = @transform_7, window_bounds = array<i64: 16, 128>}, {pipeline_mode = #tpu.pipeline_mode<synchronous>, transform_indices = @transform_8, window_bounds = array<i64: 1, 128>}, {transform_indices = @transform_9, window_bounds = array<i64: 512, 128>}]} {
    %c0 = arith.constant 0 : index
    %c0_0 = arith.constant 0 : index
    %0 = vector.load %arg1[%c0, %c0_0] : memref<512x4xf32, #tpu.memory_space<vmem>>, vector<512x4xf32>
    %c0_1 = arith.constant 0 : index
    %c0_2 = arith.constant 0 : index
    %1 = vector.load %arg2[%c0_1, %c0_2] : memref<4x32xf32, #tpu.memory_space<vmem>>, vector<4x32xf32>
    %cst = arith.constant dense<0.000000e+00> : vector<512x32xf32>
    %2 = tpu.matmul %0, %1, %cst {dimension_numbers = #tpu.dot_dimension_numbers<[1], [0], [0], [1], [0, 0, 1, 1], [], []>} : vector<512x4xf32>, vector<4x32xf32>, vector<512x32xf32> -> vector<512x32xf32>
    %c0_3 = arith.constant 0 : index
    %c0_4 = arith.constant 0 : index
    %3 = vector.load %arg3[%c0_3, %c0_4] : memref<1x32xf32, #tpu.memory_space<vmem>>, vector<1x32xf32>
    %4 = vector.broadcast %3 : vector<1x32xf32> to vector<512x32xf32>
    %5 = arith.addf %2, %4 : vector<512x32xf32>
    %cst_5 = arith.constant 0.000000e+00 : f32
    %6 = vector.broadcast %cst_5 : f32 to vector<512x32xf32>
    %7 = arith.maximumf %5, %6 : vector<512x32xf32>
    %c0_6 = arith.constant 0 : index
    %c0_7 = arith.constant 0 : index
    %8 = vector.load %arg4[%c0_6, %c0_7] : memref<32x32xf32, #tpu.memory_space<vmem>>, vector<32x32xf32>
    %cst_8 = arith.constant dense<0.000000e+00> : vector<512x32xf32>
    %9 = tpu.matmul %7, %8, %cst_8 {dimension_numbers = #tpu.dot_dimension_numbers<[1], [0], [0], [1], [0, 0, 1, 1], [], []>} : vector<512x32xf32>, vector<32x32xf32>, vector<512x32xf32> -> vector<512x32xf32>
    %c0_9 = arith.constant 0 : index
    %c0_10 = arith.constant 0 : index
    %10 = vector.load %arg5[%c0_9, %c0_10] : memref<1x32xf32, #tpu.memory_space<vmem>>, vector<1x32xf32>
    %11 = vector.broadcast %10 : vector<1x32xf32> to vector<512x32xf32>
    %12 = arith.addf %9, %11 : vector<512x32xf32>
    %cst_11 = arith.constant 0.000000e+00 : f32
    %13 = vector.broadcast %cst_11 : f32 to vector<512x32xf32>
    %14 = arith.maximumf %12, %13 : vector<512x32xf32>
    %c0_12 = arith.constant 0 : index
    %c0_13 = arith.constant 0 : index
    %15 = vector.load %arg6[%c0_12, %c0_13] : memref<32x16xf32, #tpu.memory_space<vmem>>, vector<32x16xf32>
    %cst_14 = arith.constant dense<0.000000e+00> : vector<512x16xf32>
    %16 = tpu.matmul %14, %15, %cst_14 {dimension_numbers = #tpu.dot_dimension_numbers<[1], [0], [0], [1], [0, 0, 1, 1], [], []>} : vector<512x32xf32>, vector<32x16xf32>, vector<512x16xf32> -> vector<512x16xf32>
    %c0_15 = arith.constant 0 : index
    %c0_16 = arith.constant 0 : index
    %17 = vector.load %arg7[%c0_15, %c0_16] : memref<1x16xf32, #tpu.memory_space<vmem>>, vector<1x16xf32>
    %18 = vector.broadcast %17 : vector<1x16xf32> to vector<512x16xf32>
    %19 = arith.addf %16, %18 : vector<512x16xf32>
    %cst_17 = arith.constant 0.000000e+00 : f32
    %20 = vector.broadcast %cst_17 : f32 to vector<512x16xf32>
    %21 = arith.maximumf %19, %20 : vector<512x16xf32>
    %c0_18 = arith.constant 0 : index
    %c0_19 = arith.constant 0 : index
    %22 = vector.load %arg8[%c0_18, %c0_19] : memref<16x128xf32, #tpu.memory_space<vmem>>, vector<16x128xf32>
    %cst_20 = arith.constant dense<0.000000e+00> : vector<512x128xf32>
    %23 = tpu.matmul %21, %22, %cst_20 {dimension_numbers = #tpu.dot_dimension_numbers<[1], [0], [0], [1], [0, 0, 1, 1], [], []>} : vector<512x16xf32>, vector<16x128xf32>, vector<512x128xf32> -> vector<512x128xf32>
    %c0_21 = arith.constant 0 : index
    %c0_22 = arith.constant 0 : index
    %24 = vector.load %arg9[%c0_21, %c0_22] : memref<1x128xf32, #tpu.memory_space<vmem>>, vector<1x128xf32>
    %25 = vector.broadcast %24 : vector<1x128xf32> to vector<512x128xf32>
    %26 = arith.addf %23, %25 : vector<512x128xf32>
    %27 = arith.negf %26 : vector<512x128xf32>
    %28 = math.exp %27 : vector<512x128xf32>
    %cst_23 = arith.constant 1.000000e+00 : f32
    %29 = vector.broadcast %cst_23 : f32 to vector<512x128xf32>
    %30 = arith.addf %29, %28 : vector<512x128xf32>
    %31 = arith.divf %29, %30 : vector<512x128xf32>
    %c0_24 = arith.constant 0 : index
    %c0_25 = arith.constant 0 : index
    %32 = vector.load %arg10[%c0_24, %c0_25] : memref<512x128xf32, #tpu.memory_space<vmem>>, vector<512x128xf32>
    tpu.vector_store %arg10[%c0_24, %c0_25], %31 {strides = array<i32>} : memref<512x128xf32, #tpu.memory_space<vmem>>, vector<512x128xf32>,
    return
  }
  func.func @transform_0(%arg0: i32) -> (i32, i32) {
    %c0_i32 = arith.constant 0 : i32
    %c0_i32_0 = arith.constant 0 : i32
    return %arg0, %c0_i32 : i32, i32
  }
  func.func @transform_1(%arg0: i32) -> (i32, i32) {
    %c0_i32 = arith.constant 0 : i32
    %c0_i32_0 = arith.constant 0 : i32
    %c0_i32_1 = arith.constant 0 : i32
    return %c0_i32, %c0_i32_0 : i32, i32
  }
  func.func @transform_2(%arg0: i32) -> (i32, i32) {
    %c0_i32 = arith.constant 0 : i32
    %c0_i32_0 = arith.constant 0 : i32
    %c0_i32_1 = arith.constant 0 : i32
    return %c0_i32, %c0_i32_0 : i32, i32
  }
  func.func @transform_3(%arg0: i32) -> (i32, i32) {
    %c0_i32 = arith.constant 0 : i32
    %c0_i32_0 = arith.constant 0 : i32
    %c0_i32_1 = arith.constant 0 : i32
    return %c0_i32, %c0_i32_0 : i32, i32
  }
  func.func @transform_4(%arg0: i32) -> (i32, i32) {
    %c0_i32 = arith.constant 0 : i32
    %c0_i32_0 = arith.constant 0 : i32
    %c0_i32_1 = arith.constant 0 : i32
    return %c0_i32, %c0_i32_0 : i32, i32
  }
  func.func @transform_5(%arg0: i32) -> (i32, i32) {
    %c0_i32 = arith.constant 0 : i32
    %c0_i32_0 = arith.constant 0 : i32
    %c0_i32_1 = arith.constant 0 : i32
    return %c0_i32, %c0_i32_0 : i32, i32
  }
  func.func @transform_6(%arg0: i32) -> (i32, i32) {
    %c0_i32 = arith.constant 0 : i32
    %c0_i32_0 = arith.constant 0 : i32
    %c0_i32_1 = arith.constant 0 : i32
    return %c0_i32, %c0_i32_0 : i32, i32
  }
  func.func @transform_7(%arg0: i32) -> (i32, i32) {
    %c0_i32 = arith.constant 0 : i32
    %c0_i32_0 = arith.constant 0 : i32
    %c0_i32_1 = arith.constant 0 : i32
    return %c0_i32, %c0_i32_0 : i32, i32
  }
  func.func @transform_8(%arg0: i32) -> (i32, i32) {
    %c0_i32 = arith.constant 0 : i32
    %c0_i32_0 = arith.constant 0 : i32
    %c0_i32_1 = arith.constant 0 : i32
    return %c0_i32, %c0_i32_0 : i32, i32
  }
  func.func @transform_9(%arg0: i32) -> (i32, i32) {
    %c0_i32 = arith.constant 0 : i32
    %c0_i32_0 = arith.constant 0 : i32
    return %arg0, %c0_i32 : i32, i32
  }
}

</mosaic_0001>

<bundles_post_ra>
// kernel: tpu_custom_call.1
= control target key start
LH: loop header
LB: loop body
LE: loop exit
PB: predicated region body
PF: predicated region fallthrough
CT: control target
= control target key end

     0   :  { %vm298_vm0 = vcmask 1043456   ;;  %vm105_vm1 = vcmask 31744   ;;  %s5233_s0 = inlined_call_operand.vmem [shape: f32[512,4], index: 0, kind: input, shape index: {}]   ;;  %s5234_s1 = inlined_call_operand.vmem [shape: f32[4,32], index: 1, kind: input, shape index: {}]   ;;  %s5235_s2 = inlined_call_operand.vmem [shape: f32[1,32], index: 2, kind: input, shape index: {}]   ;;  %s5236_s3 = inlined_call_operand.vmem [shape: f32[32,32], index: 3, kind: input, shape index: {}]   ;;  %s5237_s4 = inlined_call_operand.vmem [shape: f32[1,32], index: 4, kind: input, shape index: {}]   ;;  %s5238_s5 = inlined_call_operand.vmem [shape: f32[32,16], index: 5, kind: input, shape index: {}]   ;;  %s5239_s6 = inlined_call_operand.vmem [shape: f32[1,16], index: 6, kind: input, shape index: {}]   ;;  %s5240_s7 = inlined_call_operand.vmem [shape: f32[16,128], index: 7, kind: input, shape index: {}]   ;;  %s5241_s8 = inlined_call_operand.vmem [shape: f32[1,128], index: 8, kind: input, shape index: {}]   ;;  %s5242_s9 = inlined_call_operand.hbm [shape: f32[512,128], index: 9, kind: output, shape index: {}]  }
   0x1   :  { %v97_v0 = vld [vmem:[%s5234_s1] sm:$0xf]  ;;  %v34_v2 = vld [vmem:[%s5233_s0 + $0x8] sm:$0xff]  ;;  %v35_v3 = vld [vmem:[%s5233_s0 + $0x10] sm:$0xff] }
   0x2   :  { %v33_v1 = vld [vmem:[%s5233_s0] sm:$0xff]  ;;  %3699 = vmatprep.subr.msk.mxu0 %vm298_vm0, %v97_v0  ;;  %v36_v4 = vld [vmem:[%s5233_s0 + $0x18] sm:$0xff]  ;;  %v38_v6 = vld [vmem:[%s5233_s0 + $0x28] sm:$0xff] }
   0x3   :  { %3701 = vmatprep.mubr.msk.f32.mxu0 %vm105_vm1, %v33_v1  ;;  %3700 = vmatpush3.msk.msra.mxu0 %vm298_vm0, %v97_v0  ;;  %v37_v5 = vld [vmem:[%s5233_s0 + $0x20] sm:$0xff]  ;;  %v39_v7 = vld [vmem:[%s5233_s0 + $0x30] sm:$0xff]  ;;  %v40_v8 = vld [vmem:[%s5233_s0 + $0x38] sm:$0xff] }
   0x4   :  { %3702 = vmatmul.mubr.msk.f32.vlgmr.msra.gmra.mrb[0].mxu0 %vm105_vm1, %v34_v2  ;;  %v41_v9 = vld [vmem:[%s5233_s0 + $0x40] sm:$0xff]  ;;  %v42_v10 = vld [vmem:[%s5233_s0 + $0x48] sm:$0xff]  ;;  %v43_v11 = vld [vmem:[%s5233_s0 + $0x50] sm:$0xff] }
   0x5   :  { %3704 = vmatprep.mubr.msk.f32.mxu0 %vm105_vm1, %v35_v3  ;;  %v44_v12 = vld [vmem:[%s5233_s0 + $0x58] sm:$0xff]  ;;  %v45_v13 = vld [vmem:[%s5233_s0 + $0x60] sm:$0xff]  ;;  %v752_v15 = vld [vmem:[%s5236_s3 + $0x8] sm:$0xff] }
   0x6   :  { %v751_v14 = vld [vmem:[%s5236_s3] sm:$0xff] }
   0x8   :  { %3705 = vmatmul.mubr.msk.f32.gmra.mrb[2].mxu0 %vm105_vm1, %v36_v4 }
   0x9   :  { %3707 = vmatprep.mubr.msk.f32.mxu0 %vm105_vm1, %v37_v5 }
   0xc   :  { %3708 = vmatmul.mubr.msk.f32.gmra.mrb[4].mxu0 %vm105_vm1, %v38_v6 }
   0xd   :  { %3710 = vmatprep.mubr.msk.f32.mxu0 %vm105_vm1, %v39_v7 }
  0x10   :  { %3711 = vmatmul.mubr.msk.f32.gmra.mrb[6].mxu0 %vm105_vm1, %v40_v8 }
  0x11   :  { %3713 = vmatprep.mubr.msk.f32.mxu0 %vm105_vm1, %v41_v9 }
  0x14   :  { %3714 = vmatmul.mubr.msk.f32.gmra.mrb[8].mxu0 %vm105_vm1, %v42_v10 }
  0x15   :  { %3716 = vmatprep.mubr.msk.f32.mxu0 %vm105_vm1, %v43_v11 }
  0x16   :  { %14 = vsyncpa [#allocation3], 0  ;;  %v4105_v16 = vpack.c.bf16 %v752_v15, %v751_v14  ;;  %v46_v17 = vld [vmem:[%s5233_s0 + $0x68] sm:$0xff]  ;;  %v47_v18 = vld [vmem:[%s5233_s0 + $0x70] sm:$0xff]  ;;  %vm762_vm2 = vcmask 261120   ;;  %vm2065_vm3 = vcmask 130048  }
  0x17   :  { %v48_v19 = vld [vmem:[%s5233_s0 + $0x78] sm:$0xff]  ;;  %v49_v20 = vld [vmem:[%s5233_s0 + $0x80] sm:$0xff]  ;;  %v50_v21 = vld [vmem:[%s5233_s0 + $0x88] sm:$0xff] }
  0x18   :  { %3717 = vmatmul.mubr.msk.f32.gmra.mrb[10].mxu0 %vm105_vm1, %v44_v12  ;;  %4106 = vmatprep.subr.bf16.mxu1 %v4105_v16  ;;  %v51_v22 = vld [vmem:[%s5233_s0 + $0x90] sm:$0xff]  ;;  %v52_v23 = vld [vmem:[%s5233_s0 + $0x98] sm:$0xff]  ;;  %v53_v24 = vld [vmem:[%s5233_s0 + $0xa0] sm:$0xff] }
  0x19   :  { %3719 = vmatprep.mubr.msk.f32.mxu0 %vm105_vm1, %v45_v13  ;;  %4108 = vmatpush3.bf16.msra.mxu1 %v4105_v16  ;;  %v54_v25 = vld [vmem:[%s5233_s0 + $0xa8] sm:$0xff]  ;;  %v55_v26 = vld [vmem:[%s5233_s0 + $0xb0] sm:$0xff]  ;;  %v56_v27 = vld [vmem:[%s5233_s0 + $0xb8] sm:$0xff] }
  0x1a   :  { %v57_v28 = vld [vmem:[%s5233_s0 + $0xc0] sm:$0xff]  ;;  %v58_v29 = vld [vmem:[%s5233_s0 + $0xc8] sm:$0xff]  ;;  %v59_v30 = vld [vmem:[%s5233_s0 + $0xd0] sm:$0xff] }
  0x1b   :  { %v60_v31 = vld [vmem:[%s5233_s0 + $0xd8] sm:$0xff]  ;;  %v61_v32 = vld [vmem:[%s5233_s0 + $0xe0] sm:$0xff]  ;;  %v62_v33 = vld [vmem:[%s5233_s0 + $0xe8] sm:$0xff] }
  0x1c   :  { %3720 = vmatmul.mubr.msk.f32.gmra.mrb[12].mxu0 %vm105_vm1, %v46_v17  ;;  %v63_v34 = vld [vmem:[%s5233_s0 + $0xf0] sm:$0xff]  ;;  %v64_v35 = vld [vmem:[%s5233_s0 + $0xf8] sm:$0xff]  ;;  %v65_v36 = vld [vmem:[%s5233_s0 + $0x100] sm:$0xff] }
  0x1d   :  { %3722 = vmatprep.mubr.msk.f32.mxu0 %vm105_vm1, %v47_v18  ;;  %v66_v37 = vld [vmem:[%s5233_s0 + $0x108] sm:$0xff]  ;;  %v67_v38 = vld [vmem:[%s5233_s0 + $0x110] sm:$0xff]  ;;  %v68_v39 = vld [vmem:[%s5233_s0 + $0x118] sm:$0xff] }
  0x1e   :  { %v69_v40 = vld [vmem:[%s5233_s0 + $0x120] sm:$0xff]  ;;  %v70_v41 = vld [vmem:[%s5233_s0 + $0x128] sm:$0xff]  ;;  %v71_v42 = vld [vmem:[%s5233_s0 + $0x130] sm:$0xff] }
  0x1f   :  { %v72_v43 = vld [vmem:[%s5233_s0 + $0x138] sm:$0xff]  ;;  %v73_v44 = vld [vmem:[%s5233_s0 + $0x140] sm:$0xff]  ;;  %v74_v45 = vld [vmem:[%s5233_s0 + $0x148] sm:$0xff] }
  0x20   :  { %3723 = vmatmul.mubr.msk.f32.gmra.mrb[14].mxu0 %vm105_vm1, %v48_v19  ;;  %v75_v46 = vld [vmem:[%s5233_s0 + $0x150] sm:$0xff]  ;;  %v76_v47 = vld [vmem:[%s5233_s0 + $0x158] sm:$0xff]  ;;  %v77_v48 = vld [vmem:[%s5233_s0 + $0x160] sm:$0xff] }
  0x21   :  { %3725 = vmatprep.mubr.msk.f32.mxu0 %vm105_vm1, %v49_v20  ;;  %v753_v49 = vld [vmem:[%s5236_s3 + $0x10] sm:$0xff]  ;;  %v754_v50 = vld [vmem:[%s5236_s3 + $0x18] sm:$0xff]  ;;  %v78_v52 = vld [vmem:[%s5233_s0 + $0x168] sm:$0xff] }
  0x22   :  { %v4109_v51 = vpack.c.bf16 %v754_v50, %v753_v49  ;;  %v79_v53 = vld [vmem:[%s5233_s0 + $0x170] sm:$0xff]  ;;  %v80_v54 = vld [vmem:[%s5233_s0 + $0x178] sm:$0xff]  ;;  %v81_v55 = vld [vmem:[%s5233_s0 + $0x180] sm:$0xff] }
  0x23   :  { %v82_v56 = vld [vmem:[%s5233_s0 + $0x188] sm:$0xff]  ;;  %v83_v57 = vld [vmem:[%s5233_s0 + $0x190] sm:$0xff]  ;;  %v84_v58 = vld [vmem:[%s5233_s0 + $0x198] sm:$0xff] }
  0x24   :  { %3726 = vmatmul.mubr.msk.f32.gmra.mrb[16].mxu0 %vm105_vm1, %v50_v21  ;;  %4110 = vmatprep.subr.bf16.mxu1 %v4109_v51  ;;  %v85_v59 = vld [vmem:[%s5233_s0 + $0x1a0] sm:$0xff]  ;;  %v86_v60 = vld [vmem:[%s5233_s0 + $0x1a8] sm:$0xff]  ;;  %v87_v61 = vld [vmem:[%s5233_s0 + $0x1b0] sm:$0xff] }
  0x25   :  { %3728 = vmatprep.mubr.msk.f32.mxu0 %vm105_vm1, %v51_v22  ;;  %4112 = vmatpush3.bf16.msra.mxu1 %v4109_v51  ;;  %v88_v62 = vld [vmem:[%s5233_s0 + $0x1b8] sm:$0xff]  ;;  %v89_v63 = vld [vmem:[%s5233_s0 + $0x1c0] sm:$0xff]  ;;  %v90_v0 = vld [vmem:[%s5233_s0 + $0x1c8] sm:$0xff] }
  0x26   :  { %v91_v1 = vld [vmem:[%s5233_s0 + $0x1d0] sm:$0xff]  ;;  %v92_v2 = vld [vmem:[%s5233_s0 + $0x1d8] sm:$0xff]  ;;  %v93_v3 = vld [vmem:[%s5233_s0 + $0x1e0] sm:$0xff] }
  0x27   :  { %v94_v4 = vld [vmem:[%s5233_s0 + $0x1e8] sm:$0xff]  ;;  %v95_v5 = vld [vmem:[%s5233_s0 + $0x1f0] sm:$0xff]  ;;  %v96_v6 = vld [vmem:[%s5233_s0 + $0x1f8] sm:$0xff] }
  0x28   :  { %3729 = vmatmul.mubr.msk.f32.gmra.mrb[18].mxu0 %vm105_vm1, %v52_v23  ;;  %v1404_v7 = vld [vmem:[%s5238_s5] sm:$0xff]  ;;  %v1405_v8 = vld [vmem:[%s5238_s5 + $0x8] sm:$0xff]  ;;  %v1406_v15 = vld [vmem:[%s5238_s5 + $0x10] sm:$0xff] }
  0x29   :  { %3731 = vmatprep.mubr.msk.f32.mxu0 %vm105_vm1, %v53_v24  ;;  %v4113_v9 = vpack.c.bf16 %v1405_v8, %v1404_v7  ;;  %v4742_v10 = vld [vmem:[%s5235_s2] ss:$0 sm:$0xff]  ;;  %v1407_v16 = vld [vmem:[%s5238_s5 + $0x18] sm:$0xff] }
  0x2a   :  { %v4117_v19 = vpack.c.bf16 %v1407_v16, %v1406_v15 }
  0x2b   :  { %4114 = vmatprep.subr.bf16.mxu0 %v4113_v9 }
  0x2c   :  { %3732 = vmatmul.mubr.msk.f32.gmra.mrb[20].mxu0 %vm105_vm1, %v54_v25 }
  0x2d   :  { %3734 = vmatprep.mubr.msk.f32.mxu0 %vm105_vm1, %v55_v26  ;;  %4116 = vmatpush3.bf16.msra.mxu0 %v4113_v9 }
  0x2e   :  { %4118 = vmatprep.subr.bf16.mxu0 %v4117_v19 }
  0x30   :  { %3735 = vmatmul.mubr.msk.f32.gmra.mrb[22].mxu0 %vm105_vm1, %v56_v27 }
  0x31   :  { %3737 = vmatprep.mubr.msk.f32.mxu0 %vm105_vm1, %v57_v28  ;;  %4120 = vmatpush3.bf16.msra.mxu0 %v4117_v19 }
  0x34   :  { %3738 = vmatmul.mubr.msk.f32.gmra.mrb[24].mxu0 %vm105_vm1, %v58_v29 }
  0x35   :  { %3740 = vmatprep.mubr.msk.f32.mxu0 %vm105_vm1, %v59_v30 }
  0x38   :  { %3741 = vmatmul.mubr.msk.f32.gmra.mrb[26].mxu0 %vm105_vm1, %v60_v31 }
  0x39   :  { %3743 = vmatprep.mubr.msk.f32.mxu0 %vm105_vm1, %v61_v32 }
  0x3c   :  { %3744 = vmatmul.mubr.msk.f32.gmra.mrb[28].mxu0 %vm105_vm1, %v62_v33 }
  0x3d   :  { %3746 = vmatprep.mubr.msk.f32.mxu0 %vm105_vm1, %v63_v34 }
  0x40   :  { %3747 = vmatmul.mubr.msk.f32.gmra.mrb[30].mxu0 %vm105_vm1, %v64_v35 }
  0x41   :  { %3749 = vmatprep.mubr.msk.f32.mxu0 %vm105_vm1, %v65_v36 }
  0x44   :  { %3750 = vmatmul.mubr.msk.f32.gmra.mrb[32].mxu0 %vm105_vm1, %v66_v37 }
  0x45   :  { %3752 = vmatprep.mubr.msk.f32.mxu0 %vm105_vm1, %v67_v38 }
  0x48   :  { %3753 = vmatmul.mubr.msk.f32.gmra.mrb[34].mxu0 %vm105_vm1, %v68_v39 }
  0x49   :  { %3755 = vmatprep.mubr.msk.f32.mxu0 %vm105_vm1, %v69_v40 }
  0x4c   :  { %3756 = vmatmul.mubr.msk.f32.gmra.mrb[36].mxu0 %vm105_vm1, %v70_v41 }
  0x4d   :  { %3758 = vmatprep.mubr.msk.f32.mxu0 %vm105_vm1, %v71_v42 }
  0x50   :  { %3759 = vmatmul.mubr.msk.f32.gmra.mrb[38].mxu0 %vm105_vm1, %v72_v43 }
  0x51   :  { %3761 = vmatprep.mubr.msk.f32.mxu0 %vm105_vm1, %v73_v44 }
  0x54   :  { %3762 = vmatmul.mubr.msk.f32.gmra.mrb[40].mxu0 %vm105_vm1, %v74_v45 }
  0x55   :  { %3764 = vmatprep.mubr.msk.f32.mxu0 %vm105_vm1, %v75_v46 }
  0x58   :  { %3765 = vmatmul.mubr.msk.f32.gmra.mrb[42].mxu0 %vm105_vm1, %v76_v47 }
  0x59   :  { %3767 = vmatprep.mubr.msk.f32.mxu0 %vm105_vm1, %v77_v48 }
  0x5c   :  { %3768 = vmatmul.mubr.msk.f32.gmra.mrb[44].mxu0 %vm105_vm1, %v78_v52 }
  0x5d   :  { %3770 = vmatprep.mubr.msk.f32.mxu0 %vm105_vm1, %v79_v53 }
  0x60   :  { %3771 = vmatmul.mubr.msk.f32.gmra.mrb[46].mxu0 %vm105_vm1, %v80_v54 }
  0x61   :  { %3773 = vmatprep.mubr.msk.f32.mxu0 %vm105_vm1, %v81_v55 }
  0x64   :  { %3774 = vmatmul.mubr.msk.f32.gmra.mrb[48].mxu0 %vm105_vm1, %v82_v56 }
  0x65   :  { %3776 = vmatprep.mubr.msk.f32.mxu0 %vm105_vm1, %v83_v57 }
  0x68   :  { %3777 = vmatmul.mubr.msk.f32.gmra.mrb[50].mxu0 %vm105_vm1, %v84_v58 }
  0x69   :  { %3779 = vmatprep.mubr.msk.f32.mxu0 %vm105_vm1, %v85_v59 }
  0x6c   :  { %3780 = vmatmul.mubr.msk.f32.gmra.mrb[52].mxu0 %vm105_vm1, %v86_v60 }
  0x6d   :  { %3782 = vmatprep.mubr.msk.f32.mxu0 %vm105_vm1, %v87_v61 }
  0x70   :  { %3783 = vmatmul.mubr.msk.f32.gmra.mrb[54].mxu0 %vm105_vm1, %v88_v62 }
  0x71   :  { %3785 = vmatprep.mubr.msk.f32.mxu0 %vm105_vm1, %v89_v63 }
  0x74   :  { %3786 = vmatmul.mubr.msk.f32.gmra.mrb[56].mxu0 %vm105_vm1, %v90_v0 }
  0x75   :  { %3788 = vmatprep.mubr.msk.f32.mxu0 %vm105_vm1, %v91_v1 }
  0x78   :  { %3789 = vmatmul.mubr.msk.f32.gmra.mrb[58].mxu0 %vm105_vm1, %v92_v2 }
  0x79   :  { %3791 = vmatprep.mubr.msk.f32.mxu0 %vm105_vm1, %v93_v3 }
  0x7c   :  { %3792 = vmatmul.mubr.msk.f32.gmra.mrb[60].mxu0 %vm105_vm1, %v94_v4 }
  0x7d   :  { %3794 = vmatprep.mubr.msk.f32.mxu0 %vm105_vm1, %v95_v5 }
  0x80   :  { %3795 = vmatmul.mubr.msk.f32.gmra.mrb[62].mxu0 %vm105_vm1, %v96_v6 }
  0xd7   :  { %v3703_v11 = vpop.f32.mrb[0].mxu0 }
  0xd8   :  { %v374_v12 = vadd.f32 %v3703_v11, %v4742_v10  ;;  %v368_v13 = vpop.f32.mrb[1].mxu0 }
  0xd9   :  { %v369_v14 = vadd.f32 %v4742_v10, %v368_v13 }
  0xda   :  { %v688_v20 = vmax.f32 %v374_v12, 0.0 }
  0xdb   :  { %v687_v17 = vmax.f32 %v369_v14, 0.0  ;;  %v3706_v18 = vpop.f32.mrb[2].mxu0 }
  0xdc   :  { %v384_v21 = vadd.f32 %v3706_v18, %v4742_v10  ;;  %v378_v22 = vpop.f32.mrb[3].mxu0 }
  0xdd   :  { %v379_v23 = vadd.f32 %v4742_v10, %v378_v22  ;;  %3805 = vmatprep.mubr.msk.f32.mxu1 %vm762_vm2, %v687_v17 }
  0xde   :  { %3806 = vmatmul.mubr.msk.f32.vlgmr.msra.gmra.mrb[0].mxu1 %vm762_vm2, %v688_v20  ;;  %v690_v26 = vmax.f32 %v384_v21, 0.0 }
  0xdf   :  { %v689_v24 = vmax.f32 %v379_v23, 0.0  ;;  %v3709_v25 = vpop.f32.mrb[4].mxu0 }
  0xe0   :  { %v394_v27 = vadd.f32 %v3709_v25, %v4742_v10  ;;  %v388_v28 = vpop.f32.mrb[5].mxu0 }
  0xe1   :  { %v389_v29 = vadd.f32 %v4742_v10, %v388_v28  ;;  %3808 = vmatprep.mubr.msk.f32.mxu1 %vm762_vm2, %v689_v24 }
  0xe2   :  { %3809 = vmatmul.mubr.msk.f32.gmra.mrb[2].mxu1 %vm762_vm2, %v690_v26  ;;  %v692_v32 = vmax.f32 %v394_v27, 0.0 }
  0xe3   :  { %v691_v30 = vmax.f32 %v389_v29, 0.0  ;;  %v3712_v31 = vpop.f32.mrb[6].mxu0 }
  0xe4   :  { %v404_v33 = vadd.f32 %v3712_v31, %v4742_v10  ;;  %v398_v34 = vpop.f32.mrb[7].mxu0 }
  0xe5   :  { %v399_v35 = vadd.f32 %v4742_v10, %v398_v34  ;;  %3811 = vmatprep.mubr.msk.f32.mxu1 %vm762_vm2, %v691_v30 }
  0xe6   :  { %3812 = vmatmul.mubr.msk.f32.gmra.mrb[4].mxu1 %vm762_vm2, %v692_v32  ;;  %v694_v38 = vmax.f32 %v404_v33, 0.0 }
  0xe7   :  { %v693_v36 = vmax.f32 %v399_v35, 0.0  ;;  %v3715_v37 = vpop.f32.mrb[8].mxu0 }
  0xe8   :  { %v414_v39 = vadd.f32 %v3715_v37, %v4742_v10  ;;  %v408_v40 = vpop.f32.mrb[9].mxu0 }
  0xe9   :  { %v409_v41 = vadd.f32 %v4742_v10, %v408_v40  ;;  %3814 = vmatprep.mubr.msk.f32.mxu1 %vm762_vm2, %v693_v36 }
  0xea   :  { %3815 = vmatmul.mubr.msk.f32.gmra.mrb[6].mxu1 %vm762_vm2, %v694_v38  ;;  %v696_v44 = vmax.f32 %v414_v39, 0.0 }
  0xeb   :  { %v695_v42 = vmax.f32 %v409_v41, 0.0  ;;  %v3718_v43 = vpop.f32.mrb[10].mxu0 }
  0xec   :  { %v424_v45 = vadd.f32 %v3718_v43, %v4742_v10  ;;  %v418_v46 = vpop.f32.mrb[11].mxu0 }
  0xed   :  { %v419_v47 = vadd.f32 %v4742_v10, %v418_v46  ;;  %3817 = vmatprep.mubr.msk.f32.mxu1 %vm762_vm2, %v695_v42 }
  0xee   :  { %3818 = vmatmul.mubr.msk.f32.gmra.mrb[8].mxu1 %vm762_vm2, %v696_v44  ;;  %v698_v50 = vmax.f32 %v424_v45, 0.0 }
  0xef   :  { %v697_v48 = vmax.f32 %v419_v47, 0.0  ;;  %v3721_v49 = vpop.f32.mrb[12].mxu0 }
  0xf0   :  { %v434_v51 = vadd.f32 %v3721_v49, %v4742_v10  ;;  %v428_v52 = vpop.f32.mrb[13].mxu0 }
  0xf1   :  { %v429_v53 = vadd.f32 %v4742_v10, %v428_v52  ;;  %3820 = vmatprep.mubr.msk.f32.mxu1 %vm762_vm2, %v697_v48 }
  0xf2   :  { %3821 = vmatmul.mubr.msk.f32.gmra.mrb[10].mxu1 %vm762_vm2, %v698_v50  ;;  %v700_v56 = vmax.f32 %v434_v51, 0.0 }
  0xf3   :  { %v699_v54 = vmax.f32 %v429_v53, 0.0  ;;  %v3724_v55 = vpop.f32.mrb[14].mxu0 }
  0xf4   :  { %v444_v57 = vadd.f32 %v3724_v55, %v4742_v10  ;;  %v438_v58 = vpop.f32.mrb[15].mxu0 }
  0xf5   :  { %v439_v59 = vadd.f32 %v4742_v10, %v438_v58  ;;  %3823 = vmatprep.mubr.msk.f32.mxu1 %vm762_vm2, %v699_v54 }
  0xf6   :  { %3824 = vmatmul.mubr.msk.f32.gmra.mrb[12].mxu1 %vm762_vm2, %v700_v56  ;;  %v702_v62 = vmax.f32 %v444_v57, 0.0 }
  0xf7   :  { %v701_v60 = vmax.f32 %v439_v59, 0.0  ;;  %v3727_v61 = vpop.f32.mrb[16].mxu0 }
  0xf8   :  { %v454_v63 = vadd.f32 %v3727_v61, %v4742_v10  ;;  %v448_v0 = vpop.f32.mrb[17].mxu0 }
  0xf9   :  { %v449_v1 = vadd.f32 %v4742_v10, %v448_v0  ;;  %3826 = vmatprep.mubr.msk.f32.mxu1 %vm762_vm2, %v701_v60 }
  0xfa   :  { %3827 = vmatmul.mubr.msk.f32.gmra.mrb[14].mxu1 %vm762_vm2, %v702_v62  ;;  %v704_v4 = vmax.f32 %v454_v63, 0.0 }
  0xfb   :  { %v703_v2 = vmax.f32 %v449_v1, 0.0  ;;  %v3730_v3 = vpop.f32.mrb[18].mxu0 }
  0xfc   :  { %v464_v5 = vadd.f32 %v3730_v3, %v4742_v10  ;;  %v458_v6 = vpop.f32.mrb[19].mxu0 }
  0xfd   :  { %v459_v7 = vadd.f32 %v4742_v10, %v458_v6  ;;  %3829 = vmatprep.mubr.msk.f32.mxu1 %vm762_vm2, %v703_v2 }
  0xfe   :  { %3830 = vmatmul.mubr.msk.f32.gmra.mrb[16].mxu1 %vm762_vm2, %v704_v4  ;;  %v706_v11 = vmax.f32 %v464_v5, 0.0 }
  0xff   :  { %v705_v8 = vmax.f32 %v459_v7, 0.0  ;;  %v3733_v9 = vpop.f32.mrb[20].mxu0 }
 0x100   :  { %v474_v12 = vadd.f32 %v3733_v9, %v4742_v10  ;;  %v468_v13 = vpop.f32.mrb[21].mxu0 }
 0x101   :  { %v469_v14 = vadd.f32 %v4742_v10, %v468_v13  ;;  %3832 = vmatprep.mubr.msk.f32.mxu1 %vm762_vm2, %v705_v8 }
 0x102   :  { %3833 = vmatmul.mubr.msk.f32.gmra.mrb[18].mxu1 %vm762_vm2, %v706_v11  ;;  %v708_v17 = vmax.f32 %v474_v12, 0.0 }
 0x103   :  { %v707_v15 = vmax.f32 %v469_v14, 0.0  ;;  %v3736_v16 = vpop.f32.mrb[22].mxu0 }
 0x104   :  { %v484_v18 = vadd.f32 %v3736_v16, %v4742_v10  ;;  %v478_v19 = vpop.f32.mrb[23].mxu0 }
 0x105   :  { %v479_v20 = vadd.f32 %v4742_v10, %v478_v19  ;;  %3835 = vmatprep.mubr.msk.f32.mxu1 %vm762_vm2, %v707_v15 }
 0x106   :  { %3836 = vmatmul.mubr.msk.f32.gmra.mrb[20].mxu1 %vm762_vm2, %v708_v17  ;;  %v710_v23 = vmax.f32 %v484_v18, 0.0 }
 0x107   :  { %v709_v21 = vmax.f32 %v479_v20, 0.0  ;;  %v3739_v22 = vpop.f32.mrb[24].mxu0 }
 0x108   :  { %v494_v24 = vadd.f32 %v3739_v22, %v4742_v10  ;;  %v488_v25 = vpop.f32.mrb[25].mxu0 }
 0x109   :  { %v489_v26 = vadd.f32 %v4742_v10, %v488_v25  ;;  %3838 = vmatprep.mubr.msk.f32.mxu1 %vm762_vm2, %v709_v21 }
 0x10a   :  { %3839 = vmatmul.mubr.msk.f32.gmra.mrb[22].mxu1 %vm762_vm2, %v710_v23  ;;  %v712_v29 = vmax.f32 %v494_v24, 0.0 }
 0x10b   :  { %v711_v27 = vmax.f32 %v489_v26, 0.0  ;;  %v3742_v28 = vpop.f32.mrb[26].mxu0 }
 0x10c   :  { %v504_v30 = vadd.f32 %v3742_v28, %v4742_v10  ;;  %v498_v31 = vpop.f32.mrb[27].mxu0 }
 0x10d   :  { %v499_v32 = vadd.f32 %v4742_v10, %v498_v31  ;;  %3841 = vmatprep.mubr.msk.f32.mxu1 %vm762_vm2, %v711_v27 }
 0x10e   :  { %3842 = vmatmul.mubr.msk.f32.gmra.mrb[24].mxu1 %vm762_vm2, %v712_v29  ;;  %v714_v35 = vmax.f32 %v504_v30, 0.0 }
 0x10f   :  { %v713_v33 = vmax.f32 %v499_v32, 0.0  ;;  %v3745_v34 = vpop.f32.mrb[28].mxu0 }
 0x110   :  { %v514_v36 = vadd.f32 %v3745_v34, %v4742_v10  ;;  %v508_v37 = vpop.f32.mrb[29].mxu0 }
 0x111   :  { %v509_v38 = vadd.f32 %v4742_v10, %v508_v37  ;;  %3844 = vmatprep.mubr.msk.f32.mxu1 %vm762_vm2, %v713_v33 }
 0x112   :  { %3845 = vmatmul.mubr.msk.f32.gmra.mrb[26].mxu1 %vm762_vm2, %v714_v35  ;;  %v716_v41 = vmax.f32 %v514_v36, 0.0 }
 0x113   :  { %v715_v39 = vmax.f32 %v509_v38, 0.0  ;;  %v3748_v40 = vpop.f32.mrb[30].mxu0 }
 0x114   :  { %v524_v42 = vadd.f32 %v3748_v40, %v4742_v10  ;;  %v518_v43 = vpop.f32.mrb[31].mxu0 }
 0x115   :  { %v519_v44 = vadd.f32 %v4742_v10, %v518_v43  ;;  %3847 = vmatprep.mubr.msk.f32.mxu1 %vm762_vm2, %v715_v39 }
 0x116   :  { %3848 = vmatmul.mubr.msk.f32.gmra.mrb[28].mxu1 %vm762_vm2, %v716_v41  ;;  %v718_v47 = vmax.f32 %v524_v42, 0.0 }
 0x117   :  { %v717_v45 = vmax.f32 %v519_v44, 0.0  ;;  %v3751_v46 = vpop.f32.mrb[32].mxu0 }
 0x118   :  { %v534_v48 = vadd.f32 %v3751_v46, %v4742_v10  ;;  %v528_v49 = vpop.f32.mrb[33].mxu0 }
 0x119   :  { %v529_v50 = vadd.f32 %v4742_v10, %v528_v49  ;;  %3850 = vmatprep.mubr.msk.f32.mxu1 %vm762_vm2, %v717_v45 }
 0x11a   :  { %3851 = vmatmul.mubr.msk.f32.gmra.mrb[30].mxu1 %vm762_vm2, %v718_v47  ;;  %v720_v53 = vmax.f32 %v534_v48, 0.0 }
 0x11b   :  { %v719_v51 = vmax.f32 %v529_v50, 0.0  ;;  %v3754_v52 = vpop.f32.mrb[34].mxu0 }
 0x11c   :  { %v544_v54 = vadd.f32 %v3754_v52, %v4742_v10  ;;  %v538_v55 = vpop.f32.mrb[35].mxu0 }
 0x11d   :  { %v539_v56 = vadd.f32 %v4742_v10, %v538_v55  ;;  %3853 = vmatprep.mubr.msk.f32.mxu1 %vm762_vm2, %v719_v51 }
 0x11e   :  { %3854 = vmatmul.mubr.msk.f32.gmra.mrb[32].mxu1 %vm762_vm2, %v720_v53  ;;  %v722_v59 = vmax.f32 %v544_v54, 0.0 }
 0x11f   :  { %v721_v57 = vmax.f32 %v539_v56, 0.0  ;;  %v3757_v58 = vpop.f32.mrb[36].mxu0 }
 0x120   :  { %v554_v60 = vadd.f32 %v3757_v58, %v4742_v10  ;;  %v548_v61 = vpop.f32.mrb[37].mxu0 }
 0x121   :  { %v549_v62 = vadd.f32 %v4742_v10, %v548_v61  ;;  %3856 = vmatprep.mubr.msk.f32.mxu1 %vm762_vm2, %v721_v57 }
 0x122   :  { %3857 = vmatmul.mubr.msk.f32.gmra.mrb[34].mxu1 %vm762_vm2, %v722_v59  ;;  %v724_v1 = vmax.f32 %v554_v60, 0.0 }
 0x123   :  { %v723_v63 = vmax.f32 %v549_v62, 0.0  ;;  %v3760_v0 = vpop.f32.mrb[38].mxu0 }
 0x124   :  { %v564_v2 = vadd.f32 %v3760_v0, %v4742_v10  ;;  %v558_v3 = vpop.f32.mrb[39].mxu0 }
 0x125   :  { %v559_v4 = vadd.f32 %v4742_v10, %v558_v3  ;;  %3859 = vmatprep.mubr.msk.f32.mxu1 %vm762_vm2, %v723_v63 }
 0x126   :  { %3860 = vmatmul.mubr.msk.f32.gmra.mrb[36].mxu1 %vm762_vm2, %v724_v1  ;;  %v726_v7 = vmax.f32 %v564_v2, 0.0 }
 0x127   :  { %v725_v5 = vmax.f32 %v559_v4, 0.0  ;;  %v3763_v6 = vpop.f32.mrb[40].mxu0 }
 0x128   :  { %v574_v8 = vadd.f32 %v3763_v6, %v4742_v10  ;;  %v568_v9 = vpop.f32.mrb[41].mxu0 }
 0x129   :  { %v569_v11 = vadd.f32 %v4742_v10, %v568_v9  ;;  %3862 = vmatprep.mubr.msk.f32.mxu1 %vm762_vm2, %v725_v5 }
 0x12a   :  { %3863 = vmatmul.mubr.msk.f32.gmra.mrb[38].mxu1 %vm762_vm2, %v726_v7  ;;  %v728_v14 = vmax.f32 %v574_v8, 0.0 }
 0x12b   :  { %v727_v12 = vmax.f32 %v569_v11, 0.0  ;;  %v3766_v13 = vpop.f32.mrb[42].mxu0 }
 0x12c   :  { %v584_v15 = vadd.f32 %v3766_v13, %v4742_v10  ;;  %v578_v16 = vpop.f32.mrb[43].mxu0 }
 0x12d   :  { %v579_v17 = vadd.f32 %v4742_v10, %v578_v16  ;;  %3865 = vmatprep.mubr.msk.f32.mxu1 %vm762_vm2, %v727_v12 }
 0x12e   :  { %3866 = vmatmul.mubr.msk.f32.gmra.mrb[40].mxu1 %vm762_vm2, %v728_v14  ;;  %v730_v20 = vmax.f32 %v584_v15, 0.0 }
 0x12f   :  { %v729_v18 = vmax.f32 %v579_v17, 0.0  ;;  %v3769_v19 = vpop.f32.mrb[44].mxu0  ;;  %v2056_v17 = vld [vmem:[%s5240_s7] sm:$0xff] }
 0x130   :  { %v594_v21 = vadd.f32 %v3769_v19, %v4742_v10  ;;  %v588_v22 = vpop.f32.mrb[45].mxu0 }
 0x131   :  { %v589_v23 = vadd.f32 %v4742_v10, %v588_v22  ;;  %3868 = vmatprep.mubr.msk.f32.mxu1 %vm762_vm2, %v729_v18  ;;  %v2057_v18 = vld [vmem:[%s5240_s7 + $0x8] sm:$0xff] }
 0x132   :  { %3869 = vmatmul.mubr.msk.f32.gmra.mrb[42].mxu1 %vm762_vm2, %v730_v20  ;;  %v732_v26 = vmax.f32 %v594_v21, 0.0  ;;  %v4121_v19 = vpack.c.bf16 %v2057_v18, %v2056_v17 }
 0x133   :  { %v731_v24 = vmax.f32 %v589_v23, 0.0  ;;  %v3772_v25 = vpop.f32.mrb[46].mxu0 }
 0x134   :  { %v604_v27 = vadd.f32 %v3772_v25, %v4742_v10  ;;  %v598_v28 = vpop.f32.mrb[47].mxu0  ;;  %4122 = vmatprep.subr.bf16.mxu1 %v4121_v19 }
 0x135   :  { %v599_v29 = vadd.f32 %v4742_v10, %v598_v28  ;;  %3871 = vmatprep.mubr.msk.f32.mxu1 %vm762_vm2, %v731_v24  ;;  %4124 = vmatpush3.bf16.msra.mxu1 %v4121_v19 }
 0x136   :  { %3872 = vmatmul.mubr.msk.f32.gmra.mrb[44].mxu1 %vm762_vm2, %v732_v26  ;;  %v734_v32 = vmax.f32 %v604_v27, 0.0 }
 0x137   :  { %v733_v30 = vmax.f32 %v599_v29, 0.0  ;;  %v3775_v31 = vpop.f32.mrb[48].mxu0 }
 0x138   :  { %v614_v33 = vadd.f32 %v3775_v31, %v4742_v10  ;;  %v608_v34 = vpop.f32.mrb[49].mxu0 }
 0x139   :  { %v609_v35 = vadd.f32 %v4742_v10, %v608_v34  ;;  %3874 = vmatprep.mubr.msk.f32.mxu1 %vm762_vm2, %v733_v30 }
 0x13a   :  { %3875 = vmatmul.mubr.msk.f32.gmra.mrb[46].mxu1 %vm762_vm2, %v734_v32  ;;  %v736_v38 = vmax.f32 %v614_v33, 0.0 }
 0x13b   :  { %v735_v36 = vmax.f32 %v609_v35, 0.0  ;;  %v3778_v37 = vpop.f32.mrb[50].mxu0 }
 0x13c   :  { %v624_v39 = vadd.f32 %v3778_v37, %v4742_v10  ;;  %v618_v40 = vpop.f32.mrb[51].mxu0 }
 0x13d   :  { %v619_v41 = vadd.f32 %v4742_v10, %v618_v40  ;;  %3877 = vmatprep.mubr.msk.f32.mxu1 %vm762_vm2, %v735_v36 }
 0x13e   :  { %3878 = vmatmul.mubr.msk.f32.gmra.mrb[48].mxu1 %vm762_vm2, %v736_v38  ;;  %v738_v44 = vmax.f32 %v624_v39, 0.0 }
 0x13f   :  { %v737_v42 = vmax.f32 %v619_v41, 0.0  ;;  %v3781_v43 = vpop.f32.mrb[52].mxu0 }
 0x140   :  { %v634_v45 = vadd.f32 %v3781_v43, %v4742_v10  ;;  %v628_v46 = vpop.f32.mrb[53].mxu0 }
 0x141   :  { %v629_v47 = vadd.f32 %v4742_v10, %v628_v46  ;;  %3880 = vmatprep.mubr.msk.f32.mxu1 %vm762_vm2, %v737_v42 }
 0x142   :  { %3881 = vmatmul.mubr.msk.f32.gmra.mrb[50].mxu1 %vm762_vm2, %v738_v44  ;;  %v740_v50 = vmax.f32 %v634_v45, 0.0 }
 0x143   :  { %v739_v48 = vmax.f32 %v629_v47, 0.0  ;;  %v3784_v49 = vpop.f32.mrb[54].mxu0 }
 0x144   :  { %v644_v51 = vadd.f32 %v3784_v49, %v4742_v10  ;;  %v638_v52 = vpop.f32.mrb[55].mxu0 }
 0x145   :  { %v639_v53 = vadd.f32 %v4742_v10, %v638_v52  ;;  %3883 = vmatprep.mubr.msk.f32.mxu1 %vm762_vm2, %v739_v48 }
 0x146   :  { %3884 = vmatmul.mubr.msk.f32.gmra.mrb[52].mxu1 %vm762_vm2, %v740_v50  ;;  %v742_v56 = vmax.f32 %v644_v51, 0.0 }
 0x147   :  { %v741_v54 = vmax.f32 %v639_v53, 0.0  ;;  %v3787_v55 = vpop.f32.mrb[56].mxu0 }
 0x148   :  { %v654_v57 = vadd.f32 %v3787_v55, %v4742_v10  ;;  %v648_v58 = vpop.f32.mrb[57].mxu0 }
 0x149   :  { %v649_v59 = vadd.f32 %v4742_v10, %v648_v58  ;;  %3886 = vmatprep.mubr.msk.f32.mxu1 %vm762_vm2, %v741_v54 }
 0x14a   :  { %3887 = vmatmul.mubr.msk.f32.gmra.mrb[54].mxu1 %vm762_vm2, %v742_v56  ;;  %v744_v62 = vmax.f32 %v654_v57, 0.0 }
 0x14b   :  { %v743_v60 = vmax.f32 %v649_v59, 0.0  ;;  %v3790_v61 = vpop.f32.mrb[58].mxu0 }
 0x14c   :  { %v664_v63 = vadd.f32 %v3790_v61, %v4742_v10  ;;  %v658_v0 = vpop.f32.mrb[59].mxu0 }
 0x14d   :  { %v659_v1 = vadd.f32 %v4742_v10, %v658_v0  ;;  %3889 = vmatprep.mubr.msk.f32.mxu1 %vm762_vm2, %v743_v60 }
 0x14e   :  { %3890 = vmatmul.mubr.msk.f32.gmra.mrb[56].mxu1 %vm762_vm2, %v744_v62  ;;  %v746_v4 = vmax.f32 %v664_v63, 0.0 }
 0x14f   :  { %v745_v2 = vmax.f32 %v659_v1, 0.0  ;;  %v3793_v3 = vpop.f32.mrb[60].mxu0 }
 0x150   :  { %v674_v5 = vadd.f32 %v3793_v3, %v4742_v10  ;;  %v668_v6 = vpop.f32.mrb[61].mxu0 }
 0x151   :  { %v669_v7 = vadd.f32 %v4742_v10, %v668_v6  ;;  %3892 = vmatprep.mubr.msk.f32.mxu1 %vm762_vm2, %v745_v2 }
 0x152   :  { %3893 = vmatmul.mubr.msk.f32.gmra.mrb[58].mxu1 %vm762_vm2, %v746_v4  ;;  %v748_v11 = vmax.f32 %v674_v5, 0.0 }
 0x153   :  { %v747_v8 = vmax.f32 %v669_v7, 0.0  ;;  %v3796_v9 = vpop.f32.mrb[62].mxu0 }
 0x154   :  { %v684_v12 = vadd.f32 %v3796_v9, %v4742_v10  ;;  %v678_v13 = vpop.f32.mrb[63].mxu0 }
 0x155   :  { %v679_v14 = vadd.f32 %v4742_v10, %v678_v13  ;;  %3895 = vmatprep.mubr.msk.f32.mxu1 %vm762_vm2, %v747_v8  ;;  %v4887_v10 = vld [vmem:[%s5237_s4] ss:$0 sm:$0xff] }
 0x156   :  { %3896 = vmatmul.mubr.msk.f32.gmra.mrb[60].mxu1 %vm762_vm2, %v748_v11  ;;  %v750_v16 = vmax.f32 %v684_v12, 0.0 }
 0x157   :  { %v749_v15 = vmax.f32 %v679_v14, 0.0 }
 0x159   :  { %3898 = vmatprep.mubr.msk.f32.mxu1 %vm762_vm2, %v749_v15 }
 0x15a   :  { %3899 = vmatmul.mubr.msk.f32.gmra.mrb[62].mxu1 %vm762_vm2, %v750_v16 }
 0x1b1   :  { %v3807_v20 = vpop.f32.mrb[0].mxu1 }
 0x1b2   :  { %v1027_v21 = vadd.f32 %v3807_v20, %v4887_v10  ;;  %v1021_v22 = vpop.f32.mrb[1].mxu1 }
 0x1b3   :  { %v1022_v23 = vadd.f32 %v4887_v10, %v1021_v22 }
 0x1b4   :  { %v1341_v26 = vmax.f32 %v1027_v21, 0.0 }
 0x1b5   :  { %v1340_v24 = vmax.f32 %v1022_v23, 0.0  ;;  %v3810_v25 = vpop.f32.mrb[2].mxu1 }
 0x1b6   :  { %v1037_v27 = vadd.f32 %v3810_v25, %v4887_v10  ;;  %v1031_v28 = vpop.f32.mrb[3].mxu1 }
 0x1b7   :  { %v1032_v29 = vadd.f32 %v4887_v10, %v1031_v28  ;;  %3909 = vmatprep.mubr.msk.f32.mxu0 %vm762_vm2, %v1340_v24 }
 0x1b8   :  { %3910 = vmatmul.mubr.msk.f32.vlgmr.msra.gmra.mrb[64].mxu0 %vm762_vm2, %v1341_v26  ;;  %v1343_v32 = vmax.f32 %v1037_v27, 0.0 }
 0x1b9   :  { %v1342_v30 = vmax.f32 %v1032_v29, 0.0  ;;  %v3813_v31 = vpop.f32.mrb[4].mxu1 }
 0x1ba   :  { %v1047_v33 = vadd.f32 %v3813_v31, %v4887_v10  ;;  %v1041_v34 = vpop.f32.mrb[5].mxu1 }
 0x1bb   :  { %v1042_v35 = vadd.f32 %v4887_v10, %v1041_v34  ;;  %3912 = vmatprep.mubr.msk.f32.mxu0 %vm762_vm2, %v1342_v30 }
 0x1bc   :  { %3913 = vmatmul.mubr.msk.f32.gmra.mrb[66].mxu0 %vm762_vm2, %v1343_v32  ;;  %v1345_v38 = vmax.f32 %v1047_v33, 0.0 }
 0x1bd   :  { %v1344_v36 = vmax.f32 %v1042_v35, 0.0  ;;  %v3816_v37 = vpop.f32.mrb[6].mxu1 }
 0x1be   :  { %v1057_v39 = vadd.f32 %v3816_v37, %v4887_v10  ;;  %v1051_v40 = vpop.f32.mrb[7].mxu1 }
 0x1bf   :  { %v1052_v41 = vadd.f32 %v4887_v10, %v1051_v40  ;;  %3915 = vmatprep.mubr.msk.f32.mxu0 %vm762_vm2, %v1344_v36 }
 0x1c0   :  { %3916 = vmatmul.mubr.msk.f32.gmra.mrb[68].mxu0 %vm762_vm2, %v1345_v38  ;;  %v1347_v44 = vmax.f32 %v1057_v39, 0.0 }
 0x1c1   :  { %v1346_v42 = vmax.f32 %v1052_v41, 0.0  ;;  %v3819_v43 = vpop.f32.mrb[8].mxu1 }
 0x1c2   :  { %v1067_v45 = vadd.f32 %v3819_v43, %v4887_v10  ;;  %v1061_v46 = vpop.f32.mrb[9].mxu1 }
 0x1c3   :  { %v1062_v47 = vadd.f32 %v4887_v10, %v1061_v46  ;;  %3918 = vmatprep.mubr.msk.f32.mxu0 %vm762_vm2, %v1346_v42 }
 0x1c4   :  { %3919 = vmatmul.mubr.msk.f32.gmra.mrb[70].mxu0 %vm762_vm2, %v1347_v44  ;;  %v1349_v50 = vmax.f32 %v1067_v45, 0.0 }
 0x1c5   :  { %v1348_v48 = vmax.f32 %v1062_v47, 0.0  ;;  %v3822_v49 = vpop.f32.mrb[10].mxu1 }
 0x1c6   :  { %v1077_v51 = vadd.f32 %v3822_v49, %v4887_v10  ;;  %v1071_v52 = vpop.f32.mrb[11].mxu1 }
 0x1c7   :  { %v1072_v53 = vadd.f32 %v4887_v10, %v1071_v52  ;;  %3921 = vmatprep.mubr.msk.f32.mxu0 %vm762_vm2, %v1348_v48 }
 0x1c8   :  { %3922 = vmatmul.mubr.msk.f32.gmra.mrb[72].mxu0 %vm762_vm2, %v1349_v50  ;;  %v1351_v56 = vmax.f32 %v1077_v51, 0.0 }
 0x1c9   :  { %v1350_v54 = vmax.f32 %v1072_v53, 0.0  ;;  %v3825_v55 = vpop.f32.mrb[12].mxu1 }
 0x1ca   :  { %v1087_v57 = vadd.f32 %v3825_v55, %v4887_v10  ;;  %v1081_v58 = vpop.f32.mrb[13].mxu1 }
 0x1cb   :  { %v1082_v59 = vadd.f32 %v4887_v10, %v1081_v58  ;;  %3924 = vmatprep.mubr.msk.f32.mxu0 %vm762_vm2, %v1350_v54 }
 0x1cc   :  { %3925 = vmatmul.mubr.msk.f32.gmra.mrb[74].mxu0 %vm762_vm2, %v1351_v56  ;;  %v1353_v62 = vmax.f32 %v1087_v57, 0.0 }
 0x1cd   :  { %v1352_v60 = vmax.f32 %v1082_v59, 0.0  ;;  %v3828_v61 = vpop.f32.mrb[14].mxu1 }
 0x1ce   :  { %v1097_v63 = vadd.f32 %v3828_v61, %v4887_v10  ;;  %v1091_v0 = vpop.f32.mrb[15].mxu1 }
 0x1cf   :  { %v1092_v1 = vadd.f32 %v4887_v10, %v1091_v0  ;;  %3927 = vmatprep.mubr.msk.f32.mxu0 %vm762_vm2, %v1352_v60 }
 0x1d0   :  { %3928 = vmatmul.mubr.msk.f32.gmra.mrb[76].mxu0 %vm762_vm2, %v1353_v62  ;;  %v1355_v4 = vmax.f32 %v1097_v63, 0.0 }
 0x1d1   :  { %v1354_v2 = vmax.f32 %v1092_v1, 0.0  ;;  %v3831_v3 = vpop.f32.mrb[16].mxu1 }
 0x1d2   :  { %v1107_v5 = vadd.f32 %v3831_v3, %v4887_v10  ;;  %v1101_v6 = vpop.f32.mrb[17].mxu1 }
 0x1d3   :  { %v1102_v7 = vadd.f32 %v4887_v10, %v1101_v6  ;;  %3930 = vmatprep.mubr.msk.f32.mxu0 %vm762_vm2, %v1354_v2 }
 0x1d4   :  { %3931 = vmatmul.mubr.msk.f32.gmra.mrb[78].mxu0 %vm762_vm2, %v1355_v4  ;;  %v1357_v11 = vmax.f32 %v1107_v5, 0.0 }
 0x1d5   :  { %v1356_v8 = vmax.f32 %v1102_v7, 0.0  ;;  %v3834_v9 = vpop.f32.mrb[18].mxu1 }
 0x1d6   :  { %v1117_v12 = vadd.f32 %v3834_v9, %v4887_v10  ;;  %v1111_v13 = vpop.f32.mrb[19].mxu1 }
 0x1d7   :  { %v1112_v14 = vadd.f32 %v4887_v10, %v1111_v13  ;;  %3933 = vmatprep.mubr.msk.f32.mxu0 %vm762_vm2, %v1356_v8 }
 0x1d8   :  { %3934 = vmatmul.mubr.msk.f32.gmra.mrb[80].mxu0 %vm762_vm2, %v1357_v11  ;;  %v1359_v17 = vmax.f32 %v1117_v12, 0.0 }
 0x1d9   :  { %v1358_v15 = vmax.f32 %v1112_v14, 0.0  ;;  %v3837_v16 = vpop.f32.mrb[20].mxu1 }
 0x1da   :  { %v1127_v18 = vadd.f32 %v3837_v16, %v4887_v10  ;;  %v1121_v19 = vpop.f32.mrb[21].mxu1 }
 0x1db   :  { %v1122_v20 = vadd.f32 %v4887_v10, %v1121_v19  ;;  %3936 = vmatprep.mubr.msk.f32.mxu0 %vm762_vm2, %v1358_v15 }
 0x1dc   :  { %3937 = vmatmul.mubr.msk.f32.gmra.mrb[82].mxu0 %vm762_vm2, %v1359_v17  ;;  %v1361_v23 = vmax.f32 %v1127_v18, 0.0 }
 0x1dd   :  { %v1360_v21 = vmax.f32 %v1122_v20, 0.0  ;;  %v3840_v22 = vpop.f32.mrb[22].mxu1 }
 0x1de   :  { %v1137_v24 = vadd.f32 %v3840_v22, %v4887_v10  ;;  %v1131_v25 = vpop.f32.mrb[23].mxu1 }
 0x1df   :  { %v1132_v26 = vadd.f32 %v4887_v10, %v1131_v25  ;;  %3939 = vmatprep.mubr.msk.f32.mxu0 %vm762_vm2, %v1360_v21 }
 0x1e0   :  { %3940 = vmatmul.mubr.msk.f32.gmra.mrb[84].mxu0 %vm762_vm2, %v1361_v23  ;;  %v1363_v29 = vmax.f32 %v1137_v24, 0.0 }
 0x1e1   :  { %v1362_v27 = vmax.f32 %v1132_v26, 0.0  ;;  %v3843_v28 = vpop.f32.mrb[24].mxu1 }
 0x1e2   :  { %v1147_v30 = vadd.f32 %v3843_v28, %v4887_v10  ;;  %v1141_v31 = vpop.f32.mrb[25].mxu1 }
 0x1e3   :  { %v1142_v32 = vadd.f32 %v4887_v10, %v1141_v31  ;;  %3942 = vmatprep.mubr.msk.f32.mxu0 %vm762_vm2, %v1362_v27 }
 0x1e4   :  { %3943 = vmatmul.mubr.msk.f32.gmra.mrb[86].mxu0 %vm762_vm2, %v1363_v29  ;;  %v1365_v35 = vmax.f32 %v1147_v30, 0.0 }
 0x1e5   :  { %v1364_v33 = vmax.f32 %v1142_v32, 0.0  ;;  %v3846_v34 = vpop.f32.mrb[26].mxu1 }
 0x1e6   :  { %v1157_v36 = vadd.f32 %v3846_v34, %v4887_v10  ;;  %v1151_v37 = vpop.f32.mrb[27].mxu1 }
 0x1e7   :  { %v1152_v38 = vadd.f32 %v4887_v10, %v1151_v37  ;;  %3945 = vmatprep.mubr.msk.f32.mxu0 %vm762_vm2, %v1364_v33 }
 0x1e8   :  { %3946 = vmatmul.mubr.msk.f32.gmra.mrb[88].mxu0 %vm762_vm2, %v1365_v35  ;;  %v1367_v41 = vmax.f32 %v1157_v36, 0.0 }
 0x1e9   :  { %v1366_v39 = vmax.f32 %v1152_v38, 0.0  ;;  %v3849_v40 = vpop.f32.mrb[28].mxu1 }
 0x1ea   :  { %v1167_v42 = vadd.f32 %v3849_v40, %v4887_v10  ;;  %v1161_v43 = vpop.f32.mrb[29].mxu1 }
 0x1eb   :  { %v1162_v44 = vadd.f32 %v4887_v10, %v1161_v43  ;;  %3948 = vmatprep.mubr.msk.f32.mxu0 %vm762_vm2, %v1366_v39 }
 0x1ec   :  { %3949 = vmatmul.mubr.msk.f32.gmra.mrb[90].mxu0 %vm762_vm2, %v1367_v41  ;;  %v1369_v47 = vmax.f32 %v1167_v42, 0.0 }
 0x1ed   :  { %v1368_v45 = vmax.f32 %v1162_v44, 0.0  ;;  %v3852_v46 = vpop.f32.mrb[30].mxu1 }
 0x1ee   :  { %v1177_v48 = vadd.f32 %v3852_v46, %v4887_v10  ;;  %v1171_v49 = vpop.f32.mrb[31].mxu1 }
 0x1ef   :  { %v1172_v50 = vadd.f32 %v4887_v10, %v1171_v49  ;;  %3951 = vmatprep.mubr.msk.f32.mxu0 %vm762_vm2, %v1368_v45 }
 0x1f0   :  { %3952 = vmatmul.mubr.msk.f32.gmra.mrb[92].mxu0 %vm762_vm2, %v1369_v47  ;;  %v1371_v53 = vmax.f32 %v1177_v48, 0.0 }
 0x1f1   :  { %v1370_v51 = vmax.f32 %v1172_v50, 0.0  ;;  %v3855_v52 = vpop.f32.mrb[32].mxu1 }
 0x1f2   :  { %v1187_v54 = vadd.f32 %v3855_v52, %v4887_v10  ;;  %v1181_v55 = vpop.f32.mrb[33].mxu1 }
 0x1f3   :  { %v1182_v56 = vadd.f32 %v4887_v10, %v1181_v55  ;;  %3954 = vmatprep.mubr.msk.f32.mxu0 %vm762_vm2, %v1370_v51 }
 0x1f4   :  { %3955 = vmatmul.mubr.msk.f32.gmra.mrb[94].mxu0 %vm762_vm2, %v1371_v53  ;;  %v1373_v59 = vmax.f32 %v1187_v54, 0.0 }
 0x1f5   :  { %v1372_v57 = vmax.f32 %v1182_v56, 0.0  ;;  %v3858_v58 = vpop.f32.mrb[34].mxu1 }
 0x1f6   :  { %v1197_v60 = vadd.f32 %v3858_v58, %v4887_v10  ;;  %v1191_v61 = vpop.f32.mrb[35].mxu1 }
 0x1f7   :  { %v1192_v62 = vadd.f32 %v4887_v10, %v1191_v61  ;;  %3957 = vmatprep.mubr.msk.f32.mxu0 %vm762_vm2, %v1372_v57 }
 0x1f8   :  { %3958 = vmatmul.mubr.msk.f32.gmra.mrb[96].mxu0 %vm762_vm2, %v1373_v59  ;;  %v1375_v1 = vmax.f32 %v1197_v60, 0.0 }
 0x1f9   :  { %v1374_v63 = vmax.f32 %v1192_v62, 0.0  ;;  %v3861_v0 = vpop.f32.mrb[36].mxu1 }
 0x1fa   :  { %v1207_v2 = vadd.f32 %v3861_v0, %v4887_v10  ;;  %v1201_v3 = vpop.f32.mrb[37].mxu1 }
 0x1fb   :  { %v1202_v4 = vadd.f32 %v4887_v10, %v1201_v3  ;;  %3960 = vmatprep.mubr.msk.f32.mxu0 %vm762_vm2, %v1374_v63 }
 0x1fc   :  { %3961 = vmatmul.mubr.msk.f32.gmra.mrb[98].mxu0 %vm762_vm2, %v1375_v1  ;;  %v1377_v7 = vmax.f32 %v1207_v2, 0.0 }
 0x1fd   :  { %v1376_v5 = vmax.f32 %v1202_v4, 0.0  ;;  %v3864_v6 = vpop.f32.mrb[38].mxu1 }
 0x1fe   :  { %v1217_v8 = vadd.f32 %v3864_v6, %v4887_v10  ;;  %v1211_v9 = vpop.f32.mrb[39].mxu1 }
 0x1ff   :  { %v1212_v11 = vadd.f32 %v4887_v10, %v1211_v9  ;;  %3963 = vmatprep.mubr.msk.f32.mxu0 %vm762_vm2, %v1376_v5 }
 0x200   :  { %3964 = vmatmul.mubr.msk.f32.gmra.mrb[100].mxu0 %vm762_vm2, %v1377_v7  ;;  %v1379_v14 = vmax.f32 %v1217_v8, 0.0 }
 0x201   :  { %v1378_v12 = vmax.f32 %v1212_v11, 0.0  ;;  %v3867_v13 = vpop.f32.mrb[40].mxu1 }
 0x202   :  { %v1227_v15 = vadd.f32 %v3867_v13, %v4887_v10  ;;  %v1221_v16 = vpop.f32.mrb[41].mxu1 }
 0x203   :  { %v1222_v17 = vadd.f32 %v4887_v10, %v1221_v16  ;;  %3966 = vmatprep.mubr.msk.f32.mxu0 %vm762_vm2, %v1378_v12 }
 0x204   :  { %3967 = vmatmul.mubr.msk.f32.gmra.mrb[102].mxu0 %vm762_vm2, %v1379_v14  ;;  %v1381_v20 = vmax.f32 %v1227_v15, 0.0 }
 0x205   :  { %v1380_v18 = vmax.f32 %v1222_v17, 0.0  ;;  %v3870_v19 = vpop.f32.mrb[42].mxu1 }
 0x206   :  { %v1237_v21 = vadd.f32 %v3870_v19, %v4887_v10  ;;  %v1231_v22 = vpop.f32.mrb[43].mxu1 }
 0x207   :  { %v1232_v23 = vadd.f32 %v4887_v10, %v1231_v22  ;;  %3969 = vmatprep.mubr.msk.f32.mxu0 %vm762_vm2, %v1380_v18 }
 0x208   :  { %3970 = vmatmul.mubr.msk.f32.gmra.mrb[104].mxu0 %vm762_vm2, %v1381_v20  ;;  %v1383_v26 = vmax.f32 %v1237_v21, 0.0 }
 0x209   :  { %v1382_v24 = vmax.f32 %v1232_v23, 0.0  ;;  %v3873_v25 = vpop.f32.mrb[44].mxu1  ;;  %v5020_v23 = vld [vmem:[%s5239_s6] ss:$0 sm:$0xff] }
 0x20a   :  { %v1247_v27 = vadd.f32 %v3873_v25, %v4887_v10  ;;  %v1241_v28 = vpop.f32.mrb[45].mxu1 }
 0x20b   :  { %v1242_v29 = vadd.f32 %v4887_v10, %v1241_v28  ;;  %3972 = vmatprep.mubr.msk.f32.mxu0 %vm762_vm2, %v1382_v24 }
 0x20c   :  { %3973 = vmatmul.mubr.msk.f32.gmra.mrb[106].mxu0 %vm762_vm2, %v1383_v26  ;;  %v1385_v32 = vmax.f32 %v1247_v27, 0.0 }
 0x20d   :  { %v1384_v30 = vmax.f32 %v1242_v29, 0.0  ;;  %v3876_v31 = vpop.f32.mrb[46].mxu1 }
 0x20e   :  { %v1257_v33 = vadd.f32 %v3876_v31, %v4887_v10  ;;  %v1251_v34 = vpop.f32.mrb[47].mxu1 }
 0x20f   :  { %v1252_v35 = vadd.f32 %v4887_v10, %v1251_v34  ;;  %3975 = vmatprep.mubr.msk.f32.mxu0 %vm762_vm2, %v1384_v30 }
 0x210   :  { %3976 = vmatmul.mubr.msk.f32.gmra.mrb[108].mxu0 %vm762_vm2, %v1385_v32  ;;  %v1387_v38 = vmax.f32 %v1257_v33, 0.0 }
 0x211   :  { %v1386_v36 = vmax.f32 %v1252_v35, 0.0  ;;  %v3879_v37 = vpop.f32.mrb[48].mxu1 }
 0x212   :  { %v1267_v39 = vadd.f32 %v3879_v37, %v4887_v10  ;;  %v1261_v40 = vpop.f32.mrb[49].mxu1 }
 0x213   :  { %v1262_v41 = vadd.f32 %v4887_v10, %v1261_v40  ;;  %3978 = vmatprep.mubr.msk.f32.mxu0 %vm762_vm2, %v1386_v36 }
 0x214   :  { %3979 = vmatmul.mubr.msk.f32.gmra.mrb[110].mxu0 %vm762_vm2, %v1387_v38  ;;  %v1389_v44 = vmax.f32 %v1267_v39, 0.0 }
 0x215   :  { %v1388_v42 = vmax.f32 %v1262_v41, 0.0  ;;  %v3882_v43 = vpop.f32.mrb[50].mxu1 }
 0x216   :  { %v1277_v45 = vadd.f32 %v3882_v43, %v4887_v10  ;;  %v1271_v46 = vpop.f32.mrb[51].mxu1 }
 0x217   :  { %v1272_v47 = vadd.f32 %v4887_v10, %v1271_v46  ;;  %3981 = vmatprep.mubr.msk.f32.mxu0 %vm762_vm2, %v1388_v42 }
 0x218   :  { %3982 = vmatmul.mubr.msk.f32.gmra.mrb[112].mxu0 %vm762_vm2, %v1389_v44  ;;  %v1391_v50 = vmax.f32 %v1277_v45, 0.0 }
 0x219   :  { %v1390_v48 = vmax.f32 %v1272_v47, 0.0  ;;  %v3885_v49 = vpop.f32.mrb[52].mxu1 }
 0x21a   :  { %v1287_v51 = vadd.f32 %v3885_v49, %v4887_v10  ;;  %v1281_v52 = vpop.f32.mrb[53].mxu1 }
 0x21b   :  { %v1282_v53 = vadd.f32 %v4887_v10, %v1281_v52  ;;  %3984 = vmatprep.mubr.msk.f32.mxu0 %vm762_vm2, %v1390_v48 }
 0x21c   :  { %3985 = vmatmul.mubr.msk.f32.gmra.mrb[114].mxu0 %vm762_vm2, %v1391_v50  ;;  %v1393_v56 = vmax.f32 %v1287_v51, 0.0 }
 0x21d   :  { %v1392_v54 = vmax.f32 %v1282_v53, 0.0  ;;  %v3888_v55 = vpop.f32.mrb[54].mxu1 }
 0x21e   :  { %v1297_v57 = vadd.f32 %v3888_v55, %v4887_v10  ;;  %v1291_v58 = vpop.f32.mrb[55].mxu1 }
 0x21f   :  { %v1292_v59 = vadd.f32 %v4887_v10, %v1291_v58  ;;  %3987 = vmatprep.mubr.msk.f32.mxu0 %vm762_vm2, %v1392_v54 }
 0x220   :  { %3988 = vmatmul.mubr.msk.f32.gmra.mrb[116].mxu0 %vm762_vm2, %v1393_v56  ;;  %v1395_v62 = vmax.f32 %v1297_v57, 0.0 }
 0x221   :  { %v1394_v60 = vmax.f32 %v1292_v59, 0.0  ;;  %v3891_v61 = vpop.f32.mrb[56].mxu1 }
 0x222   :  { %v1307_v63 = vadd.f32 %v3891_v61, %v4887_v10  ;;  %v1301_v0 = vpop.f32.mrb[57].mxu1 }
 0x223   :  { %v1302_v1 = vadd.f32 %v4887_v10, %v1301_v0  ;;  %3990 = vmatprep.mubr.msk.f32.mxu0 %vm762_vm2, %v1394_v60 }
 0x224   :  { %3991 = vmatmul.mubr.msk.f32.gmra.mrb[118].mxu0 %vm762_vm2, %v1395_v62  ;;  %v1397_v4 = vmax.f32 %v1307_v63, 0.0 }
 0x225   :  { %v1396_v2 = vmax.f32 %v1302_v1, 0.0  ;;  %v3894_v3 = vpop.f32.mrb[58].mxu1 }
 0x226   :  { %v1317_v5 = vadd.f32 %v3894_v3, %v4887_v10  ;;  %v1311_v6 = vpop.f32.mrb[59].mxu1 }
 0x227   :  { %v1312_v7 = vadd.f32 %v4887_v10, %v1311_v6  ;;  %3993 = vmatprep.mubr.msk.f32.mxu0 %vm762_vm2, %v1396_v2 }
 0x228   :  { %3994 = vmatmul.mubr.msk.f32.gmra.mrb[120].mxu0 %vm762_vm2, %v1397_v4  ;;  %v1399_v11 = vmax.f32 %v1317_v5, 0.0 }
 0x229   :  { %v1398_v8 = vmax.f32 %v1312_v7, 0.0  ;;  %v3897_v9 = vpop.f32.mrb[60].mxu1 }
 0x22a   :  { %v1327_v12 = vadd.f32 %v3897_v9, %v4887_v10  ;;  %v1321_v13 = vpop.f32.mrb[61].mxu1 }
 0x22b   :  { %v1322_v14 = vadd.f32 %v4887_v10, %v1321_v13  ;;  %3996 = vmatprep.mubr.msk.f32.mxu0 %vm762_vm2, %v1398_v8 }
 0x22c   :  { %3997 = vmatmul.mubr.msk.f32.gmra.mrb[122].mxu0 %vm762_vm2, %v1399_v11  ;;  %v1401_v17 = vmax.f32 %v1327_v12, 0.0 }
 0x22d   :  { %v1400_v15 = vmax.f32 %v1322_v14, 0.0  ;;  %v3900_v16 = vpop.f32.mrb[62].mxu1 }
 0x22e   :  { %v1337_v18 = vadd.f32 %v3900_v16, %v4887_v10  ;;  %v1331_v19 = vpop.f32.mrb[63].mxu1 }
 0x22f   :  { %v1332_v20 = vadd.f32 %v4887_v10, %v1331_v19  ;;  %3999 = vmatprep.mubr.msk.f32.mxu0 %vm762_vm2, %v1400_v15 }
 0x230   :  { %4000 = vmatmul.mubr.msk.f32.gmra.mrb[124].mxu0 %vm762_vm2, %v1401_v17  ;;  %v1403_v22 = vmax.f32 %v1337_v18, 0.0 }
 0x231   :  { %v1402_v21 = vmax.f32 %v1332_v20, 0.0 }
 0x233   :  { %4002 = vmatprep.mubr.msk.f32.mxu0 %vm762_vm2, %v1402_v21 }
 0x234   :  { %4003 = vmatmul.mubr.msk.f32.gmra.mrb[126].mxu0 %vm762_vm2, %v1403_v22 }
 0x28b   :  { %v3911_v24 = vpop.f32.mrb[64].mxu0 }
 0x28c   :  { %v1679_v25 = vadd.f32 %v3911_v24, %v5020_v23  ;;  %v1673_v26 = vpop.f32.mrb[65].mxu0 }
 0x28d   :  { %v1674_v10 = vadd.f32 %v5020_v23, %v1673_v26 }
 0x28e   :  { %v1993_v29 = vmax.f32 %v1679_v25, 0.0 }
 0x28f   :  { %v1992_v27 = vmax.f32 %v1674_v10, 0.0  ;;  %v3914_v28 = vpop.f32.mrb[66].mxu0 }
 0x290   :  { %v1689_v30 = vadd.f32 %v3914_v28, %v5020_v23  ;;  %v1683_v31 = vpop.f32.mrb[67].mxu0 }
 0x291   :  { %v1684_v32 = vadd.f32 %v5020_v23, %v1683_v31  ;;  %4009 = vmatprep.mubr.msk.f32.mxu1 %vm2065_vm3, %v1992_v27 }
 0x292   :  { %4010 = vmatmul.mubr.msk.f32.vlgmr.msra.gmra.mrb[64].mxu1 %vm2065_vm3, %v1993_v29  ;;  %v1995_v35 = vmax.f32 %v1689_v30, 0.0 }
 0x293   :  { %v1994_v33 = vmax.f32 %v1684_v32, 0.0  ;;  %v3917_v34 = vpop.f32.mrb[68].mxu0 }
 0x294   :  { %v1699_v36 = vadd.f32 %v3917_v34, %v5020_v23  ;;  %v1693_v37 = vpop.f32.mrb[69].mxu0 }
 0x295   :  { %v1694_v38 = vadd.f32 %v5020_v23, %v1693_v37  ;;  %4012 = vmatprep.mubr.msk.f32.mxu1 %vm2065_vm3, %v1994_v33 }
 0x296   :  { %4013 = vmatmul.mubr.msk.f32.gmra.mrb[66].mxu1 %vm2065_vm3, %v1995_v35  ;;  %v1997_v41 = vmax.f32 %v1699_v36, 0.0 }
 0x297   :  { %v1996_v39 = vmax.f32 %v1694_v38, 0.0  ;;  %v3920_v40 = vpop.f32.mrb[70].mxu0 }
 0x298   :  { %v1709_v42 = vadd.f32 %v3920_v40, %v5020_v23  ;;  %v1703_v43 = vpop.f32.mrb[71].mxu0 }
 0x299   :  { %v1704_v44 = vadd.f32 %v5020_v23, %v1703_v43  ;;  %4015 = vmatprep.mubr.msk.f32.mxu1 %vm2065_vm3, %v1996_v39 }
 0x29a   :  { %4016 = vmatmul.mubr.msk.f32.gmra.mrb[68].mxu1 %vm2065_vm3, %v1997_v41  ;;  %v1999_v47 = vmax.f32 %v1709_v42, 0.0 }
 0x29b   :  { %v1998_v45 = vmax.f32 %v1704_v44, 0.0  ;;  %v3923_v46 = vpop.f32.mrb[72].mxu0 }
 0x29c   :  { %v1719_v48 = vadd.f32 %v3923_v46, %v5020_v23  ;;  %v1713_v49 = vpop.f32.mrb[73].mxu0 }
 0x29d   :  { %v1714_v50 = vadd.f32 %v5020_v23, %v1713_v49  ;;  %4018 = vmatprep.mubr.msk.f32.mxu1 %vm2065_vm3, %v1998_v45 }
 0x29e   :  { %4019 = vmatmul.mubr.msk.f32.gmra.mrb[70].mxu1 %vm2065_vm3, %v1999_v47  ;;  %v2001_v53 = vmax.f32 %v1719_v48, 0.0 }
 0x29f   :  { %v2000_v51 = vmax.f32 %v1714_v50, 0.0  ;;  %v3926_v52 = vpop.f32.mrb[74].mxu0 }
 0x2a0   :  { %v1729_v54 = vadd.f32 %v3926_v52, %v5020_v23  ;;  %v1723_v55 = vpop.f32.mrb[75].mxu0 }
 0x2a1   :  { %v1724_v56 = vadd.f32 %v5020_v23, %v1723_v55  ;;  %4021 = vmatprep.mubr.msk.f32.mxu1 %vm2065_vm3, %v2000_v51 }
 0x2a2   :  { %4022 = vmatmul.mubr.msk.f32.gmra.mrb[72].mxu1 %vm2065_vm3, %v2001_v53  ;;  %v2003_v59 = vmax.f32 %v1729_v54, 0.0 }
 0x2a3   :  { %v2002_v57 = vmax.f32 %v1724_v56, 0.0  ;;  %v3929_v58 = vpop.f32.mrb[76].mxu0 }
 0x2a4   :  { %v1739_v60 = vadd.f32 %v3929_v58, %v5020_v23  ;;  %v1733_v61 = vpop.f32.mrb[77].mxu0 }
 0x2a5   :  { %v1734_v62 = vadd.f32 %v5020_v23, %v1733_v61  ;;  %4024 = vmatprep.mubr.msk.f32.mxu1 %vm2065_vm3, %v2002_v57 }
 0x2a6   :  { %4025 = vmatmul.mubr.msk.f32.gmra.mrb[74].mxu1 %vm2065_vm3, %v2003_v59  ;;  %v2005_v1 = vmax.f32 %v1739_v60, 0.0 }
 0x2a7   :  { %v2004_v63 = vmax.f32 %v1734_v62, 0.0  ;;  %v3932_v0 = vpop.f32.mrb[78].mxu0 }
 0x2a8   :  { %v1749_v2 = vadd.f32 %v3932_v0, %v5020_v23  ;;  %v1743_v3 = vpop.f32.mrb[79].mxu0 }
 0x2a9   :  { %v1744_v4 = vadd.f32 %v5020_v23, %v1743_v3  ;;  %4027 = vmatprep.mubr.msk.f32.mxu1 %vm2065_vm3, %v2004_v63 }
 0x2aa   :  { %4028 = vmatmul.mubr.msk.f32.gmra.mrb[76].mxu1 %vm2065_vm3, %v2005_v1  ;;  %v2007_v7 = vmax.f32 %v1749_v2, 0.0 }
 0x2ab   :  { %v2006_v5 = vmax.f32 %v1744_v4, 0.0  ;;  %v3935_v6 = vpop.f32.mrb[80].mxu0 }
 0x2ac   :  { %v1759_v8 = vadd.f32 %v3935_v6, %v5020_v23  ;;  %v1753_v9 = vpop.f32.mrb[81].mxu0 }
 0x2ad   :  { %v1754_v11 = vadd.f32 %v5020_v23, %v1753_v9  ;;  %4030 = vmatprep.mubr.msk.f32.mxu1 %vm2065_vm3, %v2006_v5 }
 0x2ae   :  { %4031 = vmatmul.mubr.msk.f32.gmra.mrb[78].mxu1 %vm2065_vm3, %v2007_v7  ;;  %v2009_v14 = vmax.f32 %v1759_v8, 0.0 }
 0x2af   :  { %v2008_v12 = vmax.f32 %v1754_v11, 0.0  ;;  %v3938_v13 = vpop.f32.mrb[82].mxu0 }
 0x2b0   :  { %v1769_v15 = vadd.f32 %v3938_v13, %v5020_v23  ;;  %v1763_v16 = vpop.f32.mrb[83].mxu0 }
 0x2b1   :  { %v1764_v17 = vadd.f32 %v5020_v23, %v1763_v16  ;;  %4033 = vmatprep.mubr.msk.f32.mxu1 %vm2065_vm3, %v2008_v12 }
 0x2b2   :  { %4034 = vmatmul.mubr.msk.f32.gmra.mrb[80].mxu1 %vm2065_vm3, %v2009_v14  ;;  %v2011_v20 = vmax.f32 %v1769_v15, 0.0 }
 0x2b3   :  { %v2010_v18 = vmax.f32 %v1764_v17, 0.0  ;;  %v3941_v19 = vpop.f32.mrb[84].mxu0 }
 0x2b4   :  { %v1779_v21 = vadd.f32 %v3941_v19, %v5020_v23  ;;  %v1773_v22 = vpop.f32.mrb[85].mxu0 }
 0x2b5   :  { %v1774_v24 = vadd.f32 %v5020_v23, %v1773_v22  ;;  %4036 = vmatprep.mubr.msk.f32.mxu1 %vm2065_vm3, %v2010_v18 }
 0x2b6   :  { %4037 = vmatmul.mubr.msk.f32.gmra.mrb[82].mxu1 %vm2065_vm3, %v2011_v20  ;;  %v2013_v10 = vmax.f32 %v1779_v21, 0.0 }
 0x2b7   :  { %v2012_v25 = vmax.f32 %v1774_v24, 0.0  ;;  %v3944_v26 = vpop.f32.mrb[86].mxu0 }
 0x2b8   :  { %v1789_v27 = vadd.f32 %v3944_v26, %v5020_v23  ;;  %v1783_v28 = vpop.f32.mrb[87].mxu0 }
 0x2b9   :  { %v1784_v29 = vadd.f32 %v5020_v23, %v1783_v28  ;;  %4039 = vmatprep.mubr.msk.f32.mxu1 %vm2065_vm3, %v2012_v25 }
 0x2ba   :  { %4040 = vmatmul.mubr.msk.f32.gmra.mrb[84].mxu1 %vm2065_vm3, %v2013_v10  ;;  %v2015_v32 = vmax.f32 %v1789_v27, 0.0 }
 0x2bb   :  { %v2014_v30 = vmax.f32 %v1784_v29, 0.0  ;;  %v3947_v31 = vpop.f32.mrb[88].mxu0 }
 0x2bc   :  { %v1799_v33 = vadd.f32 %v3947_v31, %v5020_v23  ;;  %v1793_v34 = vpop.f32.mrb[89].mxu0 }
 0x2bd   :  { %v1794_v35 = vadd.f32 %v5020_v23, %v1793_v34  ;;  %4042 = vmatprep.mubr.msk.f32.mxu1 %vm2065_vm3, %v2014_v30 }
 0x2be   :  { %4043 = vmatmul.mubr.msk.f32.gmra.mrb[86].mxu1 %vm2065_vm3, %v2015_v32  ;;  %v2017_v38 = vmax.f32 %v1799_v33, 0.0 }
 0x2bf   :  { %v2016_v36 = vmax.f32 %v1794_v35, 0.0  ;;  %v3950_v37 = vpop.f32.mrb[90].mxu0 }
 0x2c0   :  { %v1809_v39 = vadd.f32 %v3950_v37, %v5020_v23  ;;  %v1803_v40 = vpop.f32.mrb[91].mxu0 }
 0x2c1   :  { %v1804_v41 = vadd.f32 %v5020_v23, %v1803_v40  ;;  %4045 = vmatprep.mubr.msk.f32.mxu1 %vm2065_vm3, %v2016_v36 }
 0x2c2   :  { %4046 = vmatmul.mubr.msk.f32.gmra.mrb[88].mxu1 %vm2065_vm3, %v2017_v38  ;;  %v2019_v44 = vmax.f32 %v1809_v39, 0.0 }
 0x2c3   :  { %v2018_v42 = vmax.f32 %v1804_v41, 0.0  ;;  %v3953_v43 = vpop.f32.mrb[92].mxu0 }
 0x2c4   :  { %v1819_v45 = vadd.f32 %v3953_v43, %v5020_v23  ;;  %v1813_v46 = vpop.f32.mrb[93].mxu0 }
 0x2c5   :  { %v1814_v47 = vadd.f32 %v5020_v23, %v1813_v46  ;;  %4048 = vmatprep.mubr.msk.f32.mxu1 %vm2065_vm3, %v2018_v42 }
 0x2c6   :  { %4049 = vmatmul.mubr.msk.f32.gmra.mrb[90].mxu1 %vm2065_vm3, %v2019_v44  ;;  %v2021_v50 = vmax.f32 %v1819_v45, 0.0 }
 0x2c7   :  { %v2020_v48 = vmax.f32 %v1814_v47, 0.0  ;;  %v3956_v49 = vpop.f32.mrb[94].mxu0 }
 0x2c8   :  { %v1829_v51 = vadd.f32 %v3956_v49, %v5020_v23  ;;  %v1823_v52 = vpop.f32.mrb[95].mxu0 }
 0x2c9   :  { %v1824_v53 = vadd.f32 %v5020_v23, %v1823_v52  ;;  %4051 = vmatprep.mubr.msk.f32.mxu1 %vm2065_vm3, %v2020_v48 }
 0x2ca   :  { %4052 = vmatmul.mubr.msk.f32.gmra.mrb[92].mxu1 %vm2065_vm3, %v2021_v50  ;;  %v2023_v56 = vmax.f32 %v1829_v51, 0.0 }
 0x2cb   :  { %v2022_v54 = vmax.f32 %v1824_v53, 0.0  ;;  %v3959_v55 = vpop.f32.mrb[96].mxu0 }
 0x2cc   :  { %v1839_v57 = vadd.f32 %v3959_v55, %v5020_v23  ;;  %v1833_v58 = vpop.f32.mrb[97].mxu0 }
 0x2cd   :  { %v1834_v59 = vadd.f32 %v5020_v23, %v1833_v58  ;;  %4054 = vmatprep.mubr.msk.f32.mxu1 %vm2065_vm3, %v2022_v54 }
 0x2ce   :  { %4055 = vmatmul.mubr.msk.f32.gmra.mrb[94].mxu1 %vm2065_vm3, %v2023_v56  ;;  %v2025_v62 = vmax.f32 %v1839_v57, 0.0 }
 0x2cf   :  { %v2024_v60 = vmax.f32 %v1834_v59, 0.0  ;;  %v3962_v61 = vpop.f32.mrb[98].mxu0 }
 0x2d0   :  { %v1849_v63 = vadd.f32 %v3962_v61, %v5020_v23  ;;  %v1843_v0 = vpop.f32.mrb[99].mxu0 }
 0x2d1   :  { %v1844_v1 = vadd.f32 %v5020_v23, %v1843_v0  ;;  %4057 = vmatprep.mubr.msk.f32.mxu1 %vm2065_vm3, %v2024_v60 }
 0x2d2   :  { %4058 = vmatmul.mubr.msk.f32.gmra.mrb[96].mxu1 %vm2065_vm3, %v2025_v62  ;;  %v2027_v4 = vmax.f32 %v1849_v63, 0.0 }
 0x2d3   :  { %v2026_v2 = vmax.f32 %v1844_v1, 0.0  ;;  %v3965_v3 = vpop.f32.mrb[100].mxu0 }
 0x2d4   :  { %v1859_v5 = vadd.f32 %v3965_v3, %v5020_v23  ;;  %v1853_v6 = vpop.f32.mrb[101].mxu0 }
 0x2d5   :  { %v1854_v7 = vadd.f32 %v5020_v23, %v1853_v6  ;;  %4060 = vmatprep.mubr.msk.f32.mxu1 %vm2065_vm3, %v2026_v2 }
 0x2d6   :  { %4061 = vmatmul.mubr.msk.f32.gmra.mrb[98].mxu1 %vm2065_vm3, %v2027_v4  ;;  %v2029_v11 = vmax.f32 %v1859_v5, 0.0 }
 0x2d7   :  { %v2028_v8 = vmax.f32 %v1854_v7, 0.0  ;;  %v3968_v9 = vpop.f32.mrb[102].mxu0 }
 0x2d8   :  { %v1869_v12 = vadd.f32 %v3968_v9, %v5020_v23  ;;  %v1863_v13 = vpop.f32.mrb[103].mxu0 }
 0x2d9   :  { %v1864_v14 = vadd.f32 %v5020_v23, %v1863_v13  ;;  %4063 = vmatprep.mubr.msk.f32.mxu1 %vm2065_vm3, %v2028_v8 }
 0x2da   :  { %4064 = vmatmul.mubr.msk.f32.gmra.mrb[100].mxu1 %vm2065_vm3, %v2029_v11  ;;  %v2031_v17 = vmax.f32 %v1869_v12, 0.0 }
 0x2db   :  { %v2030_v15 = vmax.f32 %v1864_v14, 0.0  ;;  %v3971_v16 = vpop.f32.mrb[104].mxu0 }
 0x2dc   :  { %v1879_v18 = vadd.f32 %v3971_v16, %v5020_v23  ;;  %v1873_v19 = vpop.f32.mrb[105].mxu0 }
 0x2dd   :  { %v1874_v20 = vadd.f32 %v5020_v23, %v1873_v19  ;;  %4066 = vmatprep.mubr.msk.f32.mxu1 %vm2065_vm3, %v2030_v15 }
 0x2de   :  { %4067 = vmatmul.mubr.msk.f32.gmra.mrb[102].mxu1 %vm2065_vm3, %v2031_v17  ;;  %v2033_v24 = vmax.f32 %v1879_v18, 0.0 }
 0x2df   :  { %v2032_v21 = vmax.f32 %v1874_v20, 0.0  ;;  %v3974_v22 = vpop.f32.mrb[106].mxu0 }
 0x2e0   :  { %v1889_v25 = vadd.f32 %v3974_v22, %v5020_v23  ;;  %v1883_v26 = vpop.f32.mrb[107].mxu0 }
 0x2e1   :  { %v1884_v10 = vadd.f32 %v5020_v23, %v1883_v26  ;;  %4069 = vmatprep.mubr.msk.f32.mxu1 %vm2065_vm3, %v2032_v21 }
 0x2e2   :  { %4070 = vmatmul.mubr.msk.f32.gmra.mrb[104].mxu1 %vm2065_vm3, %v2033_v24  ;;  %v2035_v29 = vmax.f32 %v1889_v25, 0.0 }
 0x2e3   :  { %v2034_v27 = vmax.f32 %v1884_v10, 0.0  ;;  %v3977_v28 = vpop.f32.mrb[108].mxu0  ;;  %v5153_v10 = vld [vmem:[%s5241_s8] ss:$0 sm:$0xff] }
 0x2e4   :  { %v1899_v30 = vadd.f32 %v3977_v28, %v5020_v23  ;;  %v1893_v31 = vpop.f32.mrb[109].mxu0 }
 0x2e5   :  { %v1894_v32 = vadd.f32 %v5020_v23, %v1893_v31  ;;  %4072 = vmatprep.mubr.msk.f32.mxu1 %vm2065_vm3, %v2034_v27 }
 0x2e6   :  { %4073 = vmatmul.mubr.msk.f32.gmra.mrb[106].mxu1 %vm2065_vm3, %v2035_v29  ;;  %v2037_v35 = vmax.f32 %v1899_v30, 0.0 }
 0x2e7   :  { %v2036_v33 = vmax.f32 %v1894_v32, 0.0  ;;  %v3980_v34 = vpop.f32.mrb[110].mxu0 }
 0x2e8   :  { %v1909_v36 = vadd.f32 %v3980_v34, %v5020_v23  ;;  %v1903_v37 = vpop.f32.mrb[111].mxu0 }
 0x2e9   :  { %v1904_v38 = vadd.f32 %v5020_v23, %v1903_v37  ;;  %4075 = vmatprep.mubr.msk.f32.mxu1 %vm2065_vm3, %v2036_v33 }
 0x2ea   :  { %4076 = vmatmul.mubr.msk.f32.gmra.mrb[108].mxu1 %vm2065_vm3, %v2037_v35  ;;  %v2039_v41 = vmax.f32 %v1909_v36, 0.0 }
 0x2eb   :  { %v2038_v39 = vmax.f32 %v1904_v38, 0.0  ;;  %v3983_v40 = vpop.f32.mrb[112].mxu0 }
 0x2ec   :  { %v1919_v42 = vadd.f32 %v3983_v40, %v5020_v23  ;;  %v1913_v43 = vpop.f32.mrb[113].mxu0 }
 0x2ed   :  { %v1914_v44 = vadd.f32 %v5020_v23, %v1913_v43  ;;  %4078 = vmatprep.mubr.msk.f32.mxu1 %vm2065_vm3, %v2038_v39 }
 0x2ee   :  { %4079 = vmatmul.mubr.msk.f32.gmra.mrb[110].mxu1 %vm2065_vm3, %v2039_v41  ;;  %v2041_v47 = vmax.f32 %v1919_v42, 0.0 }
 0x2ef   :  { %v2040_v45 = vmax.f32 %v1914_v44, 0.0  ;;  %v3986_v46 = vpop.f32.mrb[114].mxu0 }
 0x2f0   :  { %v1929_v48 = vadd.f32 %v3986_v46, %v5020_v23  ;;  %v1923_v49 = vpop.f32.mrb[115].mxu0 }
 0x2f1   :  { %v1924_v50 = vadd.f32 %v5020_v23, %v1923_v49  ;;  %4081 = vmatprep.mubr.msk.f32.mxu1 %vm2065_vm3, %v2040_v45 }
 0x2f2   :  { %4082 = vmatmul.mubr.msk.f32.gmra.mrb[112].mxu1 %vm2065_vm3, %v2041_v47  ;;  %v2043_v53 = vmax.f32 %v1929_v48, 0.0 }
 0x2f3   :  { %v2042_v51 = vmax.f32 %v1924_v50, 0.0  ;;  %v3989_v52 = vpop.f32.mrb[116].mxu0 }
 0x2f4   :  { %v1939_v54 = vadd.f32 %v3989_v52, %v5020_v23  ;;  %v1933_v55 = vpop.f32.mrb[117].mxu0 }
 0x2f5   :  { %v1934_v56 = vadd.f32 %v5020_v23, %v1933_v55  ;;  %4084 = vmatprep.mubr.msk.f32.mxu1 %vm2065_vm3, %v2042_v51 }
 0x2f6   :  { %4085 = vmatmul.mubr.msk.f32.gmra.mrb[114].mxu1 %vm2065_vm3, %v2043_v53  ;;  %v2045_v59 = vmax.f32 %v1939_v54, 0.0 }
 0x2f7   :  { %v2044_v57 = vmax.f32 %v1934_v56, 0.0  ;;  %v3992_v58 = vpop.f32.mrb[118].mxu0 }
 0x2f8   :  { %v1949_v60 = vadd.f32 %v3992_v58, %v5020_v23  ;;  %v1943_v61 = vpop.f32.mrb[119].mxu0 }
 0x2f9   :  { %v1944_v62 = vadd.f32 %v5020_v23, %v1943_v61  ;;  %4087 = vmatprep.mubr.msk.f32.mxu1 %vm2065_vm3, %v2044_v57 }
 0x2fa   :  { %4088 = vmatmul.mubr.msk.f32.gmra.mrb[116].mxu1 %vm2065_vm3, %v2045_v59  ;;  %v2047_v1 = vmax.f32 %v1949_v60, 0.0 }
 0x2fb   :  { %v2046_v63 = vmax.f32 %v1944_v62, 0.0  ;;  %v3995_v0 = vpop.f32.mrb[120].mxu0 }
 0x2fc   :  { %v1959_v2 = vadd.f32 %v3995_v0, %v5020_v23  ;;  %v1953_v3 = vpop.f32.mrb[121].mxu0 }
 0x2fd   :  { %v1954_v4 = vadd.f32 %v5020_v23, %v1953_v3  ;;  %4090 = vmatprep.mubr.msk.f32.mxu1 %vm2065_vm3, %v2046_v63 }
 0x2fe   :  { %4091 = vmatmul.mubr.msk.f32.gmra.mrb[118].mxu1 %vm2065_vm3, %v2047_v1  ;;  %v2049_v7 = vmax.f32 %v1959_v2, 0.0 }
 0x2ff   :  { %v2048_v5 = vmax.f32 %v1954_v4, 0.0  ;;  %v3998_v6 = vpop.f32.mrb[122].mxu0 }
 0x300   :  { %v1969_v8 = vadd.f32 %v3998_v6, %v5020_v23  ;;  %v1963_v9 = vpop.f32.mrb[123].mxu0 }
 0x301   :  { %v1964_v11 = vadd.f32 %v5020_v23, %v1963_v9  ;;  %4093 = vmatprep.mubr.msk.f32.mxu1 %vm2065_vm3, %v2048_v5 }
 0x302   :  { %4094 = vmatmul.mubr.msk.f32.gmra.mrb[120].mxu1 %vm2065_vm3, %v2049_v7  ;;  %v2051_v14 = vmax.f32 %v1969_v8, 0.0 }
 0x303   :  { %v2050_v12 = vmax.f32 %v1964_v11, 0.0  ;;  %v4001_v13 = vpop.f32.mrb[124].mxu0 }
 0x304   :  { %v1979_v15 = vadd.f32 %v4001_v13, %v5020_v23  ;;  %v1973_v16 = vpop.f32.mrb[125].mxu0 }
 0x305   :  { %v1974_v17 = vadd.f32 %v5020_v23, %v1973_v16  ;;  %4096 = vmatprep.mubr.msk.f32.mxu1 %vm2065_vm3, %v2050_v12 }
 0x306   :  { %4097 = vmatmul.mubr.msk.f32.gmra.mrb[122].mxu1 %vm2065_vm3, %v2051_v14  ;;  %v2053_v20 = vmax.f32 %v1979_v15, 0.0 }
 0x307   :  { %v2052_v18 = vmax.f32 %v1974_v17, 0.0  ;;  %v4004_v19 = vpop.f32.mrb[126].mxu0 }
 0x308   :  { %v1989_v21 = vadd.f32 %v4004_v19, %v5020_v23  ;;  %v1983_v22 = vpop.f32.mrb[127].mxu0 }
 0x309   :  { %v1984_v24 = vadd.f32 %v5020_v23, %v1983_v22  ;;  %4099 = vmatprep.mubr.msk.f32.mxu1 %vm2065_vm3, %v2052_v18 }
 0x30a   :  { %4100 = vmatmul.mubr.msk.f32.gmra.mrb[124].mxu1 %vm2065_vm3, %v2053_v20  ;;  %v2055_v26 = vmax.f32 %v1989_v21, 0.0 }
 0x30b   :  { %v2054_v25 = vmax.f32 %v1984_v24, 0.0 }
 0x30d   :  { %4102 = vmatprep.mubr.msk.f32.mxu1 %vm2065_vm3, %v2054_v25 }
 0x30e   :  { %4103 = vmatmul.mubr.msk.f32.gmra.mrb[126].mxu1 %vm2065_vm3, %v2055_v26 }
 0x365   :  { %v4011_v27 = vpop.f32.mrb[64].mxu1 }
 0x366   :  { %v2330_v28 = vadd.f32 %v4011_v27, %v5153_v10  ;;  %v2324_v29 = vpop.f32.mrb[65].mxu1 }
 0x367   :  { %v2325_v23 = vadd.f32 %v5153_v10, %v2324_v29 }
 0x368   :  { %v3369_v30 = vmul.f32 -1.442695, %v2330_v28 }
 0x369   :  { %v3368_v31 = vmul.f32 -1.442695, %v2325_v23  ;;  %v4014_v32 = vpop.f32.mrb[66].mxu1 }
 0x36a   :  { %4128 = vpow2.f32 %v3369_v30  ;;  %v2340_v33 = vadd.f32 %v4014_v32, %v5153_v10  ;;  %v2334_v34 = vpop.f32.mrb[67].mxu1 }
 0x36b   :  { %4130 = vpow2.f32 %v3368_v31  ;;  %v2335_v35 = vadd.f32 %v5153_v10, %v2334_v34 }
 0x36c   :  { %v3371_v36 = vmul.f32 -1.442695, %v2340_v33 }
 0x36d   :  { %v3370_v37 = vmul.f32 -1.442695, %v2335_v35  ;;  %v4017_v38 = vpop.f32.mrb[68].mxu1 }
 0x36e   :  { %4132 = vpow2.f32 %v3371_v36  ;;  %v2350_v39 = vadd.f32 %v4017_v38, %v5153_v10  ;;  %v2344_v40 = vpop.f32.mrb[69].mxu1 }
 0x36f   :  { %4134 = vpow2.f32 %v3370_v37  ;;  %v2345_v41 = vadd.f32 %v5153_v10, %v2344_v40 }
 0x370   :  { %v3373_v42 = vmul.f32 -1.442695, %v2350_v39 }
 0x371   :  { %v3372_v43 = vmul.f32 -1.442695, %v2345_v41  ;;  %v4020_v44 = vpop.f32.mrb[70].mxu1 }
 0x372   :  { %4136 = vpow2.f32 %v3373_v42  ;;  %v2360_v45 = vadd.f32 %v4020_v44, %v5153_v10  ;;  %v2354_v46 = vpop.f32.mrb[71].mxu1 }
 0x373   :  { %4138 = vpow2.f32 %v3372_v43  ;;  %v2355_v47 = vadd.f32 %v5153_v10, %v2354_v46 }
 0x374   :  { %v4129_v48 = vpop.eup %4128  ;;  %v3375_v49 = vmul.f32 -1.442695, %v2360_v45 }
 0x375   :  { %v4131_v50 = vpop.eup %4130  ;;  %v2836_v51 = vadd.f32 1.0, %v4129_v48  ;;  %v3374_v52 = vmul.f32 -1.442695, %v2355_v47  ;;  %v4023_v53 = vpop.f32.mrb[72].mxu1 }
 0x376   :  { %v2835_v54 = vadd.f32 1.0, %v4131_v50  ;;  %4140 = vpow2.f32 %v3375_v49  ;;  %v2370_v55 = vadd.f32 %v4023_v53, %v5153_v10  ;;  %v2364_v56 = vpop.f32.mrb[73].mxu1 }
 0x377   :  { %4142 = vrcp.f32 %v2836_v51  ;;  %v2365_v57 = vadd.f32 %v5153_v10, %v2364_v56 }
 0x378   :  { %v4133_v58 = vpop.eup %4132  ;;  %4144 = vrcp.f32 %v2835_v54  ;;  %v3377_v59 = vmul.f32 -1.442695, %v2370_v55 }
 0x379   :  { %v4135_v60 = vpop.eup %4134  ;;  %v2838_v61 = vadd.f32 1.0, %v4133_v58  ;;  %4146 = vpow2.f32 %v3374_v52  ;;  %v3376_v62 = vmul.f32 -1.442695, %v2365_v57  ;;  %v4026_v63 = vpop.f32.mrb[74].mxu1 }
 0x37a   :  { %v2837_v0 = vadd.f32 1.0, %v4135_v60  ;;  %4148 = vpow2.f32 %v3377_v59  ;;  %v2380_v1 = vadd.f32 %v4026_v63, %v5153_v10  ;;  %v2374_v2 = vpop.f32.mrb[75].mxu1 }
 0x37b   :  { %4150 = vrcp.f32 %v2838_v61  ;;  %v2375_v3 = vadd.f32 %v5153_v10, %v2374_v2 }
 0x37c   :  { %v4137_v4 = vpop.eup %4136  ;;  %4152 = vrcp.f32 %v2837_v0  ;;  %v3379_v5 = vmul.f32 -1.442695, %v2380_v1 }
 0x37d   :  { %v4139_v6 = vpop.eup %4138  ;;  %v2840_v7 = vadd.f32 1.0, %v4137_v4  ;;  %4154 = vpow2.f32 %v3376_v62  ;;  %v3378_v8 = vmul.f32 -1.442695, %v2375_v3  ;;  %v4029_v9 = vpop.f32.mrb[76].mxu1 }
 0x37e   :  { %v2839_v11 = vadd.f32 1.0, %v4139_v6  ;;  %4156 = vpow2.f32 %v3379_v5  ;;  %v2390_v12 = vadd.f32 %v4029_v9, %v5153_v10  ;;  %v2384_v13 = vpop.f32.mrb[77].mxu1 }
 0x37f   :  { %4158 = vrcp.f32 %v2840_v7  ;;  %v2385_v14 = vadd.f32 %v5153_v10, %v2384_v13 }
 0x380   :  { %v4141_v15 = vpop.eup %4140  ;;  %4160 = vrcp.f32 %v2839_v11  ;;  %v3381_v16 = vmul.f32 -1.442695, %v2390_v12 }
 0x381   :  { %v4143_v17 = vpop.eup %4142  ;;  %v2842_v18 = vadd.f32 1.0, %v4141_v15  ;;  %4162 = vpow2.f32 %v3378_v8  ;;  %v3380_v19 = vmul.f32 -1.442695, %v2385_v14  ;;  %v4032_v20 = vpop.f32.mrb[78].mxu1 }
 0x382   :  { %v4145_v21 = vpop.eup %4144  ;;  %3028 = vst [vmem:[#allocation2 + $0x8] sm:$0xff] %v4143_v17  ;;  %4164 = vpow2.f32 %v3381_v16  ;;  %v2400_v22 = vadd.f32 %v4032_v20, %v5153_v10  ;;  %v2394_v24 = vpop.f32.mrb[79].mxu1 }
 0x383   :  { %v4147_v25 = vpop.eup %4146  ;;  %3027 = vst [vmem:[#allocation2] sm:$0xff] %v4145_v21  ;;  %4166 = vrcp.f32 %v2842_v18  ;;  %v2395_v26 = vadd.f32 %v5153_v10, %v2394_v24 }
 0x384   :  { %v4149_v27 = vpop.eup %4148  ;;  %v2841_v28 = vadd.f32 1.0, %v4147_v25  ;;  %4168 = vpow2.f32 %v3380_v19  ;;  %v3383_v29 = vmul.f32 -1.442695, %v2400_v22 }
 0x385   :  { %v4151_v23 = vpop.eup %4150  ;;  %v2844_v30 = vadd.f32 1.0, %v4149_v27  ;;  %v3382_v31 = vmul.f32 -1.442695, %v2395_v26  ;;  %v4035_v32 = vpop.f32.mrb[80].mxu1 }
 0x386   :  { %v4153_v33 = vpop.eup %4152  ;;  %3030 = vst [vmem:[#allocation2 + $0x18] sm:$0xff] %v4151_v23  ;;  %4170 = vrcp.f32 %v2841_v28  ;;  %v2410_v34 = vadd.f32 %v4035_v32, %v5153_v10  ;;  %v2404_v35 = vpop.f32.mrb[81].mxu1 }
 0x387   :  { %v4155_v36 = vpop.eup %4154  ;;  %3029 = vst [vmem:[#allocation2 + $0x10] sm:$0xff] %v4153_v33  ;;  %4172 = vrcp.f32 %v2844_v30  ;;  %v2405_v37 = vadd.f32 %v5153_v10, %v2404_v35 }
 0x388   :  { %v4157_v38 = vpop.eup %4156  ;;  %v2843_v39 = vadd.f32 1.0, %v4155_v36  ;;  %4174 = vpow2.f32 %v3383_v29  ;;  %v3385_v40 = vmul.f32 -1.442695, %v2410_v34 }
 0x389   :  { %v4159_v41 = vpop.eup %4158  ;;  %v2846_v42 = vadd.f32 1.0, %v4157_v38  ;;  %4176 = vpow2.f32 %v3382_v31  ;;  %v3384_v43 = vmul.f32 -1.442695, %v2405_v37  ;;  %v4038_v44 = vpop.f32.mrb[82].mxu1 }
 0x38a   :  { %v4161_v45 = vpop.eup %4160  ;;  %3032 = vst [vmem:[#allocation2 + $0x28] sm:$0xff] %v4159_v41  ;;  %4178 = vrcp.f32 %v2843_v39  ;;  %v2420_v46 = vadd.f32 %v4038_v44, %v5153_v10  ;;  %v2414_v47 = vpop.f32.mrb[83].mxu1 }
 0x38b   :  { %v4163_v48 = vpop.eup %4162  ;;  %3031 = vst [vmem:[#allocation2 + $0x20] sm:$0xff] %v4161_v45  ;;  %4180 = vrcp.f32 %v2846_v42  ;;  %v2415_v49 = vadd.f32 %v5153_v10, %v2414_v47 }
 0x38c   :  { %v4165_v50 = vpop.eup %4164  ;;  %v2845_v51 = vadd.f32 1.0, %v4163_v48  ;;  %4182 = vpow2.f32 %v3385_v40  ;;  %v3387_v52 = vmul.f32 -1.442695, %v2420_v46 }
 0x38d   :  { %v4167_v53 = vpop.eup %4166  ;;  %v2848_v54 = vadd.f32 1.0, %v4165_v50  ;;  %4184 = vpow2.f32 %v3384_v43  ;;  %v4041_v55 = vpop.f32.mrb[84].mxu1  ;;  %v3386_v57 = vmul.f32 -1.442695, %v2415_v49 }
 0x38e   :  { %v4169_v56 = vpop.eup %4168  ;;  %3034 = vst [vmem:[#allocation2 + $0x38] sm:$0xff] %v4167_v53  ;;  %4186 = vrcp.f32 %v2845_v51  ;;  %v2430_v58 = vadd.f32 %v4041_v55, %v5153_v10  ;;  %v2424_v59 = vpop.f32.mrb[85].mxu1 }
 0x38f   :  { %4188 = vrcp.f32 %v2848_v54  ;;  %v2847_v60 = vadd.f32 1.0, %v4169_v56  ;;  %v2425_v61 = vadd.f32 %v5153_v10, %v2424_v59 }
 0x390   :  { %v4171_v62 = vpop.eup %4170  ;;  %4190 = vpow2.f32 %v3387_v52  ;;  %v3389_v63 = vmul.f32 -1.442695, %v2430_v58 }
 0x391   :  { %v4173_v0 = vpop.eup %4172  ;;  %3033 = vst [vmem:[#allocation2 + $0x30] sm:$0xff] %v4171_v62  ;;  %4192 = vrcp.f32 %v2847_v60  ;;  %v3388_v1 = vmul.f32 -1.442695, %v2425_v61  ;;  %v4044_v2 = vpop.f32.mrb[86].mxu1 }
 0x392   :  { %v4175_v3 = vpop.eup %4174  ;;  %3036 = vst [vmem:[#allocation2 + $0x48] sm:$0xff] %v4173_v0  ;;  %4194 = vpow2.f32 %v3386_v57  ;;  %v2440_v4 = vadd.f32 %v4044_v2, %v5153_v10  ;;  %v2434_v5 = vpop.f32.mrb[87].mxu1 }
 0x393   :  { %v4177_v6 = vpop.eup %4176  ;;  %v2850_v7 = vadd.f32 1.0, %v4175_v3  ;;  %4196 = vpow2.f32 %v3389_v63  ;;  %v2435_v8 = vadd.f32 %v5153_v10, %v2434_v5 }
 0x394   :  { %v4179_v9 = vpop.eup %4178  ;;  %v2849_v11 = vadd.f32 1.0, %v4177_v6  ;;  %4198 = vpow2.f32 %v3388_v1  ;;  %v3391_v12 = vmul.f32 -1.442695, %v2440_v4 }
 0x395   :  { %v4181_v13 = vpop.eup %4180  ;;  %3035 = vst [vmem:[#allocation2 + $0x40] sm:$0xff] %v4179_v9  ;;  %4200 = vrcp.f32 %v2850_v7  ;;  %v3390_v14 = vmul.f32 -1.442695, %v2435_v8  ;;  %v4047_v15 = vpop.f32.mrb[88].mxu1 }
 0x396   :  { %v4183_v16 = vpop.eup %4182  ;;  %3038 = vst [vmem:[#allocation2 + $0x58] sm:$0xff] %v4181_v13  ;;  %4202 = vrcp.f32 %v2849_v11  ;;  %v2450_v17 = vadd.f32 %v4047_v15, %v5153_v10  ;;  %v2444_v18 = vpop.f32.mrb[89].mxu1 }
 0x397   :  { %v4185_v19 = vpop.eup %4184  ;;  %v2852_v20 = vadd.f32 1.0, %v4183_v16  ;;  %4204 = vpow2.f32 %v3391_v12  ;;  %v2445_v21 = vadd.f32 %v5153_v10, %v2444_v18 }
 0x398   :  { %v4187_v22 = vpop.eup %4186  ;;  %v2851_v24 = vadd.f32 1.0, %v4185_v19  ;;  %4206 = vpow2.f32 %v3390_v14  ;;  %v3393_v25 = vmul.f32 -1.442695, %v2450_v17 }
 0x399   :  { %v4189_v26 = vpop.eup %4188  ;;  %3037 = vst [vmem:[#allocation2 + $0x50] sm:$0xff] %v4187_v22  ;;  %4208 = vrcp.f32 %v2852_v20  ;;  %v3392_v27 = vmul.f32 -1.442695, %v2445_v21  ;;  %v4050_v28 = vpop.f32.mrb[90].mxu1 }
 0x39a   :  { %v4191_v29 = vpop.eup %4190  ;;  %3040 = vst [vmem:[#allocation2 + $0x68] sm:$0xff] %v4189_v26  ;;  %4210 = vrcp.f32 %v2851_v24  ;;  %v2460_v23 = vadd.f32 %v4050_v28, %v5153_v10  ;;  %v2454_v30 = vpop.f32.mrb[91].mxu1 }
 0x39b   :  { %v4193_v31 = vpop.eup %4192  ;;  %v2854_v32 = vadd.f32 1.0, %v4191_v29  ;;  %4212 = vpow2.f32 %v3393_v25  ;;  %v2455_v33 = vadd.f32 %v5153_v10, %v2454_v30 }
 0x39c   :  { %v4195_v34 = vpop.eup %4194  ;;  %3039 = vst [vmem:[#allocation2 + $0x60] sm:$0xff] %v4193_v31  ;;  %4214 = vpow2.f32 %v3392_v27  ;;  %v3395_v35 = vmul.f32 -1.442695, %v2460_v23 }
 0x39d   :  { %v4197_v36 = vpop.eup %4196  ;;  %4216 = vrcp.f32 %v2854_v32  ;;  %v2853_v37 = vadd.f32 1.0, %v4195_v34  ;;  %v4053_v38 = vpop.f32.mrb[92].mxu1  ;;  %v3394_v41 = vmul.f32 -1.442695, %v2455_v33 }
 0x39e   :  { %v4199_v39 = vpop.eup %4198  ;;  %v2856_v40 = vadd.f32 1.0, %v4197_v36  ;;  %4218 = vpow2.f32 %v3395_v35  ;;  %v2470_v42 = vadd.f32 %v4053_v38, %v5153_v10  ;;  %v2464_v43 = vpop.f32.mrb[93].mxu1 }
 0x39f   :  { %v4201_v44 = vpop.eup %4200  ;;  %4220 = vrcp.f32 %v2853_v37  ;;  %v2855_v45 = vadd.f32 1.0, %v4199_v39  ;;  %v2465_v46 = vadd.f32 %v5153_v10, %v2464_v43 }
 0x3a0   :  { %v4203_v47 = vpop.eup %4202  ;;  %3042 = vst [vmem:[#allocation2 + $0x78] sm:$0xff] %v4201_v44  ;;  %4222 = vrcp.f32 %v2856_v40  ;;  %v3397_v48 = vmul.f32 -1.442695, %v2470_v42 }
 0x3a1   :  { %v4205_v49 = vpop.eup %4204  ;;  %3041 = vst [vmem:[#allocation2 + $0x70] sm:$0xff] %v4203_v47  ;;  %4224 = vrcp.f32 %v2855_v45  ;;  %v4056_v50 = vpop.f32.mrb[94].mxu1  ;;  %v3396_v53 = vmul.f32 -1.442695, %v2465_v46 }
 0x3a2   :  { %v4207_v51 = vpop.eup %4206  ;;  %v2858_v52 = vadd.f32 1.0, %v4205_v49  ;;  %4226 = vpow2.f32 %v3394_v41  ;;  %v2480_v54 = vadd.f32 %v4056_v50, %v5153_v10  ;;  %v2474_v55 = vpop.f32.mrb[95].mxu1 }
 0x3a3   :  { %v4209_v56 = vpop.eup %4208  ;;  %v2857_v57 = vadd.f32 1.0, %v4207_v51  ;;  %4228 = vpow2.f32 %v3397_v48  ;;  %v2475_v58 = vadd.f32 %v5153_v10, %v2474_v55 }
 0x3a4   :  { %v4211_v59 = vpop.eup %4210  ;;  %3044 = vst [vmem:[#allocation2 + $0x88] sm:$0xff] %v4209_v56  ;;  %4230 = vrcp.f32 %v2858_v52  ;;  %v3399_v60 = vmul.f32 -1.442695, %v2480_v54 }
 0x3a5   :  { %v4213_v61 = vpop.eup %4212  ;;  %3043 = vst [vmem:[#allocation2 + $0x80] sm:$0xff] %v4211_v59  ;;  %4232 = vrcp.f32 %v2857_v57  ;;  %v4059_v62 = vpop.f32.mrb[96].mxu1  ;;  %v3398_v1 = vmul.f32 -1.442695, %v2475_v58 }
 0x3a6   :  { %v4215_v63 = vpop.eup %4214  ;;  %v2860_v0 = vadd.f32 1.0, %v4213_v61  ;;  %4234 = vpow2.f32 %v3396_v53  ;;  %v2490_v2 = vadd.f32 %v4059_v62, %v5153_v10  ;;  %v2484_v3 = vpop.f32.mrb[97].mxu1 }
 0x3a7   :  { %v4217_v4 = vpop.eup %4216  ;;  %v2859_v5 = vadd.f32 1.0, %v4215_v63  ;;  %4236 = vpow2.f32 %v3399_v60  ;;  %v2485_v6 = vadd.f32 %v5153_v10, %v2484_v3 }
 0x3a8   :  { %v4219_v7 = vpop.eup %4218  ;;  %3046 = vst [vmem:[#allocation2 + $0x98] sm:$0xff] %v4217_v4  ;;  %4238 = vrcp.f32 %v2860_v0  ;;  %v3401_v8 = vmul.f32 -1.442695, %v2490_v2 }
 0x3a9   :  { %v4221_v9 = vpop.eup %4220  ;;  %4240 = vrcp.f32 %v2859_v5  ;;  %v2862_v11 = vadd.f32 1.0, %v4219_v7  ;;  %v3400_v12 = vmul.f32 -1.442695, %v2485_v6  ;;  %v4062_v13 = vpop.f32.mrb[98].mxu1 }
 0x3aa   :  { %v4223_v14 = vpop.eup %4222  ;;  %3045 = vst [vmem:[#allocation2 + $0x90] sm:$0xff] %v4221_v9  ;;  %4242 = vpow2.f32 %v3398_v1  ;;  %v2500_v15 = vadd.f32 %v4062_v13, %v5153_v10  ;;  %v2494_v16 = vpop.f32.mrb[99].mxu1 }
 0x3ab   :  { %v4225_v17 = vpop.eup %4224  ;;  %3048 = vst [vmem:[#allocation2 + $0xa8] sm:$0xff] %v4223_v14  ;;  %4244 = vrcp.f32 %v2862_v11  ;;  %v2495_v18 = vadd.f32 %v5153_v10, %v2494_v16 }
 0x3ac   :  { %v4227_v19 = vpop.eup %4226  ;;  %3047 = vst [vmem:[#allocation2 + $0xa0] sm:$0xff] %v4225_v17  ;;  %4246 = vpow2.f32 %v3401_v8  ;;  %v3403_v20 = vmul.f32 -1.442695, %v2500_v15 }
 0x3ad   :  { %v4229_v21 = vpop.eup %4228  ;;  %v2861_v22 = vadd.f32 1.0, %v4227_v19  ;;  %4248 = vpow2.f32 %v3400_v12  ;;  %v3402_v24 = vmul.f32 -1.442695, %v2495_v18  ;;  %v4065_v25 = vpop.f32.mrb[100].mxu1 }
 0x3ae   :  { %v4231_v26 = vpop.eup %4230  ;;  %v2864_v27 = vadd.f32 1.0, %v4229_v21  ;;  %4250 = vpow2.f32 %v3403_v20  ;;  %v2510_v28 = vadd.f32 %v4065_v25, %v5153_v10  ;;  %v2504_v29 = vpop.f32.mrb[101].mxu1 }
 0x3af   :  { %v4233_v23 = vpop.eup %4232  ;;  %3050 = vst [vmem:[#allocation2 + $0xb8] sm:$0xff] %v4231_v26  ;;  %4252 = vrcp.f32 %v2861_v22  ;;  %v2505_v30 = vadd.f32 %v5153_v10, %v2504_v29 }
 0x3b0   :  { %v4235_v31 = vpop.eup %4234  ;;  %3049 = vst [vmem:[#allocation2 + $0xb0] sm:$0xff] %v4233_v23  ;;  %4254 = vrcp.f32 %v2864_v27  ;;  %v3405_v32 = vmul.f32 -1.442695, %v2510_v28 }
 0x3b1   :  { %v4237_v33 = vpop.eup %4236  ;;  %v2863_v34 = vadd.f32 1.0, %v4235_v31  ;;  %4256 = vpow2.f32 %v3402_v24  ;;  %v3404_v35 = vmul.f32 -1.442695, %v2505_v30  ;;  %v4068_v36 = vpop.f32.mrb[102].mxu1 }
 0x3b2   :  { %v4239_v37 = vpop.eup %4238  ;;  %v2866_v38 = vadd.f32 1.0, %v4237_v33  ;;  %4258 = vpow2.f32 %v3405_v32  ;;  %v2520_v39 = vadd.f32 %v4068_v36, %v5153_v10  ;;  %v2514_v40 = vpop.f32.mrb[103].mxu1 }
 0x3b3   :  { %v4241_v41 = vpop.eup %4240  ;;  %3052 = vst [vmem:[#allocation2 + $0xc8] sm:$0xff] %v4239_v37  ;;  %4260 = vrcp.f32 %v2863_v34  ;;  %v2515_v42 = vadd.f32 %v5153_v10, %v2514_v40 }
 0x3b4   :  { %v4243_v43 = vpop.eup %4242  ;;  %3051 = vst [vmem:[#allocation2 + $0xc0] sm:$0xff] %v4241_v41  ;;  %4262 = vrcp.f32 %v2866_v38  ;;  %v3407_v44 = vmul.f32 -1.442695, %v2520_v39 }
 0x3b5   :  { %v4245_v45 = vpop.eup %4244  ;;  %v2865_v46 = vadd.f32 1.0, %v4243_v43  ;;  %4264 = vpow2.f32 %v3404_v35  ;;  %v3406_v47 = vmul.f32 -1.442695, %v2515_v42  ;;  %v4071_v48 = vpop.f32.mrb[104].mxu1 }
 0x3b6   :  { %v4247_v49 = vpop.eup %4246  ;;  %3054 = vst [vmem:[#allocation2 + $0xd8] sm:$0xff] %v4245_v45  ;;  %4266 = vpow2.f32 %v3407_v44  ;;  %v2530_v50 = vadd.f32 %v4071_v48, %v5153_v10  ;;  %v2524_v51 = vpop.f32.mrb[105].mxu1 }
 0x3b7   :  { %v4249_v52 = vpop.eup %4248  ;;  %4268 = vrcp.f32 %v2865_v46  ;;  %v2868_v53 = vadd.f32 1.0, %v4247_v49  ;;  %v2525_v54 = vadd.f32 %v5153_v10, %v2524_v51 }
 0x3b8   :  { %v4251_v55 = vpop.eup %4250  ;;  %v2867_v56 = vadd.f32 1.0, %v4249_v52  ;;  %4270 = vpow2.f32 %v3406_v47  ;;  %v3409_v57 = vmul.f32 -1.442695, %v2530_v50 }
 0x3b9   :  { %v4253_v58 = vpop.eup %4252  ;;  %4272 = vrcp.f32 %v2868_v53  ;;  %v2870_v59 = vadd.f32 1.0, %v4251_v55  ;;  %v3408_v60 = vmul.f32 -1.442695, %v2525_v54  ;;  %v4074_v61 = vpop.f32.mrb[106].mxu1 }
 0x3ba   :  { %v4255_v62 = vpop.eup %4254  ;;  %3053 = vst [vmem:[#allocation2 + $0xd0] sm:$0xff] %v4253_v58  ;;  %4274 = vrcp.f32 %v2867_v56  ;;  %v2540_v63 = vadd.f32 %v4074_v61, %v5153_v10  ;;  %v2534_v0 = vpop.f32.mrb[107].mxu1 }
 0x3bb   :  { %v4257_v1 = vpop.eup %4256  ;;  %3056 = vst [vmem:[#allocation2 + $0xe8] sm:$0xff] %v4255_v62  ;;  %4276 = vrcp.f32 %v2870_v59  ;;  %v2535_v2 = vadd.f32 %v5153_v10, %v2534_v0 }
 0x3bc   :  { %v4259_v3 = vpop.eup %4258  ;;  %v2869_v4 = vadd.f32 1.0, %v4257_v1  ;;  %4278 = vpow2.f32 %v3409_v57  ;;  %v3411_v5 = vmul.f32 -1.442695, %v2540_v63 }
 0x3bd   :  { %v4261_v6 = vpop.eup %4260  ;;  %v2872_v7 = vadd.f32 1.0, %v4259_v3  ;;  %4280 = vpow2.f32 %v3408_v60  ;;  %v3410_v8 = vmul.f32 -1.442695, %v2535_v2  ;;  %v4077_v9 = vpop.f32.mrb[108].mxu1 }
 0x3be   :  { %v4263_v11 = vpop.eup %4262  ;;  %3055 = vst [vmem:[#allocation2 + $0xe0] sm:$0xff] %v4261_v6  ;;  %4282 = vrcp.f32 %v2869_v4  ;;  %v2550_v12 = vadd.f32 %v4077_v9, %v5153_v10  ;;  %v2544_v13 = vpop.f32.mrb[109].mxu1 }
 0x3bf   :  { %v4265_v14 = vpop.eup %4264  ;;  %3058 = vst [vmem:[#allocation2 + $0xf8] sm:$0xff] %v4263_v11  ;;  %4284 = vrcp.f32 %v2872_v7  ;;  %v2545_v15 = vadd.f32 %v5153_v10, %v2544_v13 }
 0x3c0   :  { %v4267_v16 = vpop.eup %4266  ;;  %v2871_v17 = vadd.f32 1.0, %v4265_v14  ;;  %4286 = vpow2.f32 %v3411_v5  ;;  %v3413_v18 = vmul.f32 -1.442695, %v2550_v12 }
 0x3c1   :  { %v4269_v19 = vpop.eup %4268  ;;  %v2874_v20 = vadd.f32 1.0, %v4267_v16  ;;  %4288 = vpow2.f32 %v3410_v8  ;;  %v4080_v21 = vpop.f32.mrb[110].mxu1  ;;  %v3412_v24 = vmul.f32 -1.442695, %v2545_v15 }
 0x3c2   :  { %v4271_v22 = vpop.eup %4270  ;;  %3057 = vst [vmem:[#allocation2 + $0xf0] sm:$0xff] %v4269_v19  ;;  %4290 = vrcp.f32 %v2871_v17  ;;  %v2560_v25 = vadd.f32 %v4080_v21, %v5153_v10  ;;  %v2554_v26 = vpop.f32.mrb[111].mxu1 }
 0x3c3   :  { %v4273_v27 = vpop.eup %4272  ;;  %4292 = vrcp.f32 %v2874_v20  ;;  %v2873_v28 = vadd.f32 1.0, %v4271_v22  ;;  %v2555_v29 = vadd.f32 %v5153_v10, %v2554_v26 }
 0x3c4   :  { %v4275_v23 = vpop.eup %4274  ;;  %3060 = vst [vmem:[#allocation2 + $0x108] sm:$0xff] %v4273_v27  ;;  %4294 = vpow2.f32 %v3413_v18  ;;  %v3415_v30 = vmul.f32 -1.442695, %v2560_v25 }
 0x3c5   :  { %v4277_v31 = vpop.eup %4276  ;;  %3059 = vst [vmem:[#allocation2 + $0x100] sm:$0xff] %v4275_v23  ;;  %4296 = vrcp.f32 %v2873_v28  ;;  %v3414_v32 = vmul.f32 -1.442695, %v2555_v29  ;;  %v4083_v33 = vpop.f32.mrb[112].mxu1 }
 0x3c6   :  { %v4279_v34 = vpop.eup %4278  ;;  %3062 = vst [vmem:[#allocation2 + $0x118] sm:$0xff] %v4277_v31  ;;  %4298 = vpow2.f32 %v3412_v24  ;;  %v2570_v35 = vadd.f32 %v4083_v33, %v5153_v10  ;;  %v2564_v36 = vpop.f32.mrb[113].mxu1 }
 0x3c7   :  { %v4281_v37 = vpop.eup %4280  ;;  %v2876_v38 = vadd.f32 1.0, %v4279_v34  ;;  %4300 = vpow2.f32 %v3415_v30  ;;  %v2565_v39 = vadd.f32 %v5153_v10, %v2564_v36 }
 0x3c8   :  { %v4283_v40 = vpop.eup %4282  ;;  %v2875_v41 = vadd.f32 1.0, %v4281_v37  ;;  %4302 = vpow2.f32 %v3414_v32  ;;  %v3417_v42 = vmul.f32 -1.442695, %v2570_v35 }
 0x3c9   :  { %v4285_v43 = vpop.eup %4284  ;;  %3061 = vst [vmem:[#allocation2 + $0x110] sm:$0xff] %v4283_v40  ;;  %4304 = vrcp.f32 %v2876_v38  ;;  %v3416_v44 = vmul.f32 -1.442695, %v2565_v39  ;;  %v4086_v45 = vpop.f32.mrb[114].mxu1 }
 0x3ca   :  { %v4287_v46 = vpop.eup %4286  ;;  %3064 = vst [vmem:[#allocation2 + $0x128] sm:$0xff] %v4285_v43  ;;  %4306 = vrcp.f32 %v2875_v41  ;;  %v2580_v47 = vadd.f32 %v4086_v45, %v5153_v10  ;;  %v2574_v48 = vpop.f32.mrb[115].mxu1 }
 0x3cb   :  { %v4289_v49 = vpop.eup %4288  ;;  %v2878_v50 = vadd.f32 1.0, %v4287_v46  ;;  %4308 = vpow2.f32 %v3417_v42  ;;  %v2575_v51 = vadd.f32 %v5153_v10, %v2574_v48 }
 0x3cc   :  { %v4291_v52 = vpop.eup %4290  ;;  %v2877_v53 = vadd.f32 1.0, %v4289_v49  ;;  %4310 = vpow2.f32 %v3416_v44  ;;  %v3419_v54 = vmul.f32 -1.442695, %v2580_v47 }
 0x3cd   :  { %v4293_v55 = vpop.eup %4292  ;;  %3063 = vst [vmem:[#allocation2 + $0x120] sm:$0xff] %v4291_v52  ;;  %4312 = vrcp.f32 %v2878_v50  ;;  %v3418_v56 = vmul.f32 -1.442695, %v2575_v51  ;;  %v4089_v57 = vpop.f32.mrb[116].mxu1 }
 0x3ce   :  { %v4295_v58 = vpop.eup %4294  ;;  %3066 = vst [vmem:[#allocation2 + $0x138] sm:$0xff] %v4293_v55  ;;  %4314 = vrcp.f32 %v2877_v53  ;;  %v2590_v59 = vadd.f32 %v4089_v57, %v5153_v10  ;;  %v2584_v60 = vpop.f32.mrb[117].mxu1 }
 0x3cf   :  { %v4297_v61 = vpop.eup %4296  ;;  %v2880_v62 = vadd.f32 1.0, %v4295_v58  ;;  %4316 = vpow2.f32 %v3419_v54  ;;  %v2585_v63 = vadd.f32 %v5153_v10, %v2584_v60  ;;  %v4384_v60 = vld [vmem:[%s5241_s8] ss:$0 sm:$0xff]  ;;  %s4409_s8 = smov [#allocation2]  }
 0x3d0   :  { %v4299_v0 = vpop.eup %4298  ;;  %3065 = vst [vmem:[#allocation2 + $0x130] sm:$0xff] %v4297_v61  ;;  %4318 = vpow2.f32 %v3418_v56  ;;  %v3421_v1 = vmul.f32 -1.442695, %v2590_v59  ;;  %s3096_s27 = sshll.u32 %s4409_s8, 4  ;;  %s3097_s27 = int_to_ptr.vmem [resolvable:$true] %s3096_s27 }
 0x3d1   :  { %v4301_v2 = vpop.eup %4300  ;;  %4320 = vrcp.f32 %v2880_v62  ;;  %v2879_v3 = vadd.f32 1.0, %v4299_v0  ;;  %v4092_v4 = vpop.f32.mrb[118].mxu1  ;;  %v3420_v7 = vmul.f32 -1.442695, %v2585_v63  ;;  %s4385_s28 = scalar_lea.vmem %s3097_s27, 8192  ;;  %p4390_p1 = scmp.lt.s32.totalorder %s3097_s27, %s3097_s27 }
 0x3d2   :  { %v4303_v5 = vpop.eup %4302  ;;  %v2882_v6 = vadd.f32 1.0, %v4301_v2  ;;  %4322 = vpow2.f32 %v3421_v1  ;;  %v2600_v8 = vadd.f32 %v4092_v4, %v5153_v10  ;;  %v2594_v9 = vpop.f32.mrb[119].mxu1  ;;  %p4386_p0 = scmp.ne.s32.totalorder %s3097_s27, %s4385_s28  ;;  %p4391_p2 = scmp.lt.s32.totalorder %s4385_s28, %s4385_s28 }
 0x3d3   :  { %v4305_v11 = vpop.eup %4304  ;;  %4324 = vrcp.f32 %v2879_v3  ;;  %v2881_v12 = vadd.f32 1.0, %v4303_v5  ;;  %v2595_v13 = vadd.f32 %v5153_v10, %v2594_v9 }
 0x3d4   :  { %v4307_v14 = vpop.eup %4306  ;;  %3068 = vst [vmem:[#allocation2 + $0x148] sm:$0xff] %v4305_v11  ;;  %4326 = vrcp.f32 %v2882_v6  ;;  %v3423_v15 = vmul.f32 -1.442695, %v2600_v8  ;;  %p4392_p3 = por %p4391_p2, %p4390_p1 }
 0x3d5   :  { %v4309_v16 = vpop.eup %4308  ;;  %3067 = vst [vmem:[#allocation2 + $0x140] sm:$0xff] %v4307_v14  ;;  %4328 = vrcp.f32 %v2881_v12  ;;  %v4095_v17 = vpop.f32.mrb[120].mxu1  ;;  %v3422_v20 = vmul.f32 -1.442695, %v2595_v13 }
 0x3d6   :  { %v4311_v18 = vpop.eup %4310  ;;  %v2884_v19 = vadd.f32 1.0, %v4309_v16  ;;  %4330 = vpow2.f32 %v3420_v7  ;;  %v2610_v21 = vadd.f32 %v4095_v17, %v5153_v10  ;;  %v2604_v22 = vpop.f32.mrb[121].mxu1  ;;  %p4393_p4 = pnand %p4392_p3, %p4386_p0 }
 0x3d7   :  { %v4313_v24 = vpop.eup %4312  ;;  %v2883_v25 = vadd.f32 1.0, %v4311_v18  ;;  %4332 = vpow2.f32 %v3423_v15  ;;  %v2605_v26 = vadd.f32 %v5153_v10, %v2604_v22 }
 0x3d8   :  { %v4315_v27 = vpop.eup %4314  ;;  %3070 = vst [vmem:[#allocation2 + $0x158] sm:$0xff] %v4313_v24  ;;  %4334 = vrcp.f32 %v2884_v19  ;;  %v3425_v28 = vmul.f32 -1.442695, %v2610_v21 }
 0x3d9   :  { %v4317_v29 = vpop.eup %4316  ;;  %3069 = vst [vmem:[#allocation2 + $0x150] sm:$0xff] %v4315_v27  ;;  %4336 = vrcp.f32 %v2883_v25  ;;  %v4098_v23 = vpop.f32.mrb[122].mxu1  ;;  %v3424_v32 = vmul.f32 -1.442695, %v2605_v26 }
 0x3da   :  { %v4319_v30 = vpop.eup %4318  ;;  %v2886_v31 = vadd.f32 1.0, %v4317_v29  ;;  %4338 = vpow2.f32 %v3422_v20  ;;  %v2620_v33 = vadd.f32 %v4098_v23, %v5153_v10  ;;  %v2614_v34 = vpop.f32.mrb[123].mxu1 }
 0x3db   :  { %v4321_v35 = vpop.eup %4320  ;;  %v2885_v36 = vadd.f32 1.0, %v4319_v30  ;;  %4340 = vpow2.f32 %v3425_v28  ;;  %v2615_v37 = vadd.f32 %v5153_v10, %v2614_v34 }
 0x3dc   :  { %v4323_v38 = vpop.eup %4322  ;;  %3072 = vst [vmem:[#allocation2 + $0x168] sm:$0xff] %v4321_v35  ;;  %4342 = vrcp.f32 %v2886_v31  ;;  %v3427_v39 = vmul.f32 -1.442695, %v2620_v33 }
 0x3dd   :  { %v4325_v40 = vpop.eup %4324  ;;  %4344 = vrcp.f32 %v2885_v36  ;;  %v2888_v41 = vadd.f32 1.0, %v4323_v38  ;;  %v3426_v42 = vmul.f32 -1.442695, %v2615_v37  ;;  %v4101_v43 = vpop.f32.mrb[124].mxu1 }
 0x3de   :  { %v4327_v44 = vpop.eup %4326  ;;  %3071 = vst [vmem:[#allocation2 + $0x160] sm:$0xff] %v4325_v40  ;;  %4346 = vpow2.f32 %v3424_v32  ;;  %v2630_v45 = vadd.f32 %v4101_v43, %v5153_v10  ;;  %v2624_v46 = vpop.f32.mrb[125].mxu1 }
 0x3df   :  { %v4329_v47 = vpop.eup %4328  ;;  %3074 = vst [vmem:[#allocation2 + $0x178] sm:$0xff] %v4327_v44  ;;  %4348 = vrcp.f32 %v2888_v41  ;;  %v2625_v48 = vadd.f32 %v5153_v10, %v2624_v46 }
 0x3e0   :  { %v4331_v49 = vpop.eup %4330  ;;  %3073 = vst [vmem:[#allocation2 + $0x170] sm:$0xff] %v4329_v47  ;;  %4350 = vpow2.f32 %v3427_v39  ;;  %v3429_v50 = vmul.f32 -1.442695, %v2630_v45 }
 0x3e1   :  { %v4333_v51 = vpop.eup %4332  ;;  %v2887_v52 = vadd.f32 1.0, %v4331_v49  ;;  %4352 = vpow2.f32 %v3426_v42  ;;  %v3428_v53 = vmul.f32 -1.442695, %v2625_v48  ;;  %v4104_v54 = vpop.f32.mrb[126].mxu1 }
 0x3e2   :  { %v4335_v55 = vpop.eup %4334  ;;  %v2890_v56 = vadd.f32 1.0, %v4333_v51  ;;  %4354 = vpow2.f32 %v3429_v50  ;;  %v2640_v57 = vadd.f32 %v4104_v54, %v5153_v10  ;;  %v2634_v58 = vpop.f32.mrb[127].mxu1 }
 0x3e3   :  { %v4337_v59 = vpop.eup %4336  ;;  %3076 = vst [vmem:[#allocation2 + $0x188] sm:$0xff] %v4335_v55  ;;  %4356 = vrcp.f32 %v2887_v52  ;;  %v2635_v61 = vadd.f32 %v4384_v60, %v2634_v58 }
 0x3e4   :  { %v4339_v62 = vpop.eup %4338  ;;  %3075 = vst [vmem:[#allocation2 + $0x180] sm:$0xff] %v4337_v59  ;;  %4358 = vrcp.f32 %v2890_v56  ;;  %v3431_v63 = vmul.f32 -1.442695, %v2640_v57 }
 0x3e5   :  { %v4341_v0 = vpop.eup %4340  ;;  %v2889_v1 = vadd.f32 1.0, %v4339_v62  ;;  %4360 = vpow2.f32 %v3428_v53  ;;  %v3430_v2 = vmul.f32 -1.442695, %v2635_v61 }
 0x3e6   :  { %v4343_v3 = vpop.eup %4342  ;;  %v2892_v4 = vadd.f32 1.0, %v4341_v0  ;;  %4362 = vpow2.f32 %v3431_v63 }
 0x3e7   :  { %v4345_v10 = vpop.eup %4344  ;;  %3078 = vst [vmem:[#allocation2 + $0x198] sm:$0xff] %v4343_v3  ;;  %4364 = vrcp.f32 %v2889_v1 }
 0x3e8   :  { %v4347_v5 = vpop.eup %4346  ;;  %3077 = vst [vmem:[#allocation2 + $0x190] sm:$0xff] %v4345_v10  ;;  %4366 = vrcp.f32 %v2892_v4 }
 0x3e9   :  { %v4349_v6 = vpop.eup %4348  ;;  %v2891_v7 = vadd.f32 1.0, %v4347_v5  ;;  %4368 = vpow2.f32 %v3430_v2 }
 0x3ea   :  { %v4351_v8 = vpop.eup %4350  ;;  %3080 = vst [vmem:[#allocation2 + $0x1a8] sm:$0xff] %v4349_v6 }
 0x3eb   :  { %v4353_v9 = vpop.eup %4352  ;;  %4370 = vrcp.f32 %v2891_v7  ;;  %v2894_v11 = vadd.f32 1.0, %v4351_v8 }
 0x3ec   :  { %v4355_v12 = vpop.eup %4354  ;;  %v2893_v13 = vadd.f32 1.0, %v4353_v9 }
 0x3ed   :  { %v4357_v14 = vpop.eup %4356  ;;  %4372 = vrcp.f32 %v2894_v11  ;;  %v2896_v15 = vadd.f32 1.0, %v4355_v12 }
 0x3ee   :  { %v4359_v16 = vpop.eup %4358  ;;  %3079 = vst [vmem:[#allocation2 + $0x1a0] sm:$0xff] %v4357_v14  ;;  %4374 = vrcp.f32 %v2893_v13 }
 0x3ef   :  { %v4361_v17 = vpop.eup %4360  ;;  %3082 = vst [vmem:[#allocation2 + $0x1b8] sm:$0xff] %v4359_v16  ;;  %4376 = vrcp.f32 %v2896_v15 }
 0x3f0   :  { %v4363_v18 = vpop.eup %4362  ;;  %v2895_v19 = vadd.f32 1.0, %v4361_v17 }
 0x3f1   :  { %v4365_v20 = vpop.eup %4364  ;;  %v2898_v21 = vadd.f32 1.0, %v4363_v18 }
 0x3f2   :  { %v4367_v22 = vpop.eup %4366  ;;  %3081 = vst [vmem:[#allocation2 + $0x1b0] sm:$0xff] %v4365_v20  ;;  %4378 = vrcp.f32 %v2895_v19 }
 0x3f3   :  { %v4369_v24 = vpop.eup %4368  ;;  %3084 = vst [vmem:[#allocation2 + $0x1c8] sm:$0xff] %v4367_v22  ;;  %4380 = vrcp.f32 %v2898_v21 }
 0x3f4   :  { %v2897_v25 = vadd.f32 1.0, %v4369_v24 }
 0x3f5   :  { %v4371_v26 = vpop.eup %4370 }
 0x3f6   :  { %3083 = vst [vmem:[#allocation2 + $0x1c0] sm:$0xff] %v4371_v26  ;;  %4382 = vrcp.f32 %v2897_v25 }
 0x3f7   :  { %v4373_v27 = vpop.eup %4372 }
 0x3f8   :  { %v4375_v28 = vpop.eup %4374  ;;  %3086 = vst [vmem:[#allocation2 + $0x1d8] sm:$0xff] %v4373_v27 }
 0x3f9   :  { %v4377_v29 = vpop.eup %4376  ;;  %3085 = vst [vmem:[#allocation2 + $0x1d0] sm:$0xff] %v4375_v28 }
 0x3fa   :  { %3088 = vst [vmem:[#allocation2 + $0x1e8] sm:$0xff] %v4377_v29 }
 0x3fc   :  { %v4379_v23 = vpop.eup %4378 }
 0x3fd   :  { %v4381_v30 = vpop.eup %4380  ;;  %3087 = vst [vmem:[#allocation2 + $0x1e0] sm:$0xff] %v4379_v23 }
 0x3fe   :  { %3090 = vst [vmem:[#allocation2 + $0x1f8] sm:$0xff] %v4381_v30 }
 0x400   :  { %v4383_v31 = vpop.eup %4382 }
 0x401   :  { %3089 = vst [vmem:[#allocation2 + $0x1f0] sm:$0xff] %v4383_v31 }
 0x402   :  { %4396 = shalt.err (!%p4393_p4)
}
 0x403   :  { %s4397_s10 = scalar_lea.hbm %s5242_s9, 8192 }
 0x404   :  { %p4398_p5 = scmp.ne.s32.totalorder %s5242_s9, %s4397_s10  ;;  %p4401_p6 = scmp.lt.u32.totalorder %s4397_s10, %s5242_s9 }
 0x406   :  { %p4403_p7 = pnand %p4401_p6, %p4398_p5 }
 0x408   :  { %4406 = shalt.err (!%p4403_p7)
}
 0x409   :  { %s4410_s15 = smov 128   ;;  %s4411_s16 = smov 8  }
 0x40a   :  { %3102 = dma.vmem_to_hbm [thread:$0]  %s3097_s27, 8192, %s5242_s9, [#allocation3], %s4410_s15, %s4410_s15, %s4411_s16  }
 0x40b   :  { %4407 = dma.done.wait [#allocation3], 8192  }
 0x40c   :  { %4408 = vsyncadd [#allocation3], 4294959104 }
 0x40d   :  { %3106 = vsyncpa [#allocation3], 1 }

</bundles_post_ra>
